<compile_context>
chip_gen: v5e
topology: v5e:2x2
jax: 0.10.0
libtpu: 0.0.40
codegen_flags: <defaults>
</compile_context>

<pallas_src>
import functools

import jax
import jax.numpy as jnp
import numpy as np
from jax.experimental import pallas as pl
from jax.experimental.pallas import tpu as pltpu


# ----------------------------------------------------------------------------
# Fused kernel.
# ----------------------------------------------------------------------------
def _lfm_kernel(x_ref, wf_t_ref, bf_ref, wg_t_ref, bg_ref, tile_ref,
                r_all_ref, w_all_ref, b_ref, bo_ref, out_ref, *,
                approx_recip=True):
    f32, bf16 = jnp.float32, jnp.bfloat16
    x = x_ref[...]                                           # (S, D) f32
    D = x.shape[1]
    A = wf_t_ref.shape[1]
    E = wg_t_ref.shape[1]

    # Featurizer on the mean token (bf16 MXU operands, f32 accumulate).
    x_mean = jnp.mean(x, axis=0, keepdims=True)              # (1, D) f32
    adapt = (jnp.dot(x_mean.astype(bf16), wf_t_ref[...],
                     preferred_element_type=f32) + bf_ref[...])      # (1, A)

    # MoE gating softmax (all f32 elementwise; denominator on the EUP).
    logits = (jnp.dot(adapt.astype(bf16), wg_t_ref[...],
                      preferred_element_type=f32) + bg_ref[...])     # (1, E)
    m = jnp.max(logits, axis=-1, keepdims=True)
    e = jnp.exp(logits - m)
    denom = jnp.sum(e, axis=-1, keepdims=True)
    if approx_recip:
        gate = e * pl.reciprocal(denom, approx=True)
    else:
        gate = e / denom                                     # exact, validation

    # kron(I_D, adapt): (D, D*A).  The D^2*A selector mask is built in-kernel
    # from iotas (no HBM constant); the A-tiling of adapt uses one tiny matmul
    # against a (A, D*A) 0/1 constant.
    adapt_tiled = jnp.dot(adapt.astype(bf16), tile_ref[...],
                          preferred_element_type=f32)        # (1, D*A)
    ri = jax.lax.broadcasted_iota(jnp.int32, (D, D * A), 0)
    ci = jax.lax.broadcasted_iota(jnp.int32, (D, D * A), 1)
    mask = (ci >= ri * A) & (ci < (ri + 1) * A)
    kron = jnp.where(mask, adapt_tiled, 0.0).astype(bf16)    # (D, D*A) bf16

    # ONE fused, lane-dense delta matmul for every adaptive layer, then one
    # f32 add against the column-stacked base weights (adapt biases already
    # folded in at prep time).  Column blocks of W_eff:
    #   [ token-mix | channel-mix | expert_0 .. expert_{E-1} | out-proj | pad ]
    delta_all = jnp.dot(kron, r_all_ref[...],
                        preferred_element_type=f32)          # (D, NC) f32
    weff = w_all_ref[...] + delta_all                        # (D, NC) f32

    def block(j):                                            # (D, D) f32 slice
        return weff[:, j * D:(j + 1) * D]

    # Token mixing, then channel mixing.
    y = jnp.dot(x.astype(bf16), block(0).astype(bf16),
                preferred_element_type=f32) + b_ref[0]       # (S, D)
    y = jnp.dot(y.astype(bf16), block(1).astype(bf16),
                preferred_element_type=f32) + b_ref[1]       # (S, D)

    # MoE as a gate-weighted effective weight (exact: experts are affine).
    # Gate weighting now touches only (D, D) single-vreg blocks.
    w_moe = gate[:, 0:1] * block(2)
    b_moe = gate[:, 0:1] * b_ref[2]
    for ex in range(1, E):
        g = gate[:, ex:ex + 1]
        w_moe = w_moe + g * block(2 + ex)
        b_moe = b_moe + g * b_ref[2 + ex]
    moe = jnp.dot(y.astype(bf16), w_moe.astype(bf16),
                  preferred_element_type=f32) + b_moe        # (S, D)

    # Output projection (its columns ride in the same W_eff slab; delta = 0).
    out = (jnp.dot(moe.astype(bf16), block(2 + E).astype(bf16),
                   preferred_element_type=f32) + bo_ref[...])
    out_ref[...] = out.astype(out_ref.dtype)


# ----------------------------------------------------------------------------
# One-time parameter preparation (hoisted out of the hot path).
# ----------------------------------------------------------------------------
def prepare_params(p):
    """Transpose / stack / reorganise / cast everything once so the forward
    pass has zero XLA layout glue and bf16 MXU operands."""
    f32, bf16 = jnp.float32, jnp.bfloat16
    D = p['wtm'].shape[0]
    A = p['wf'].shape[0]
    E = p['wg'].shape[0]
    n_blocks = 2 + E + 1                       # tm, cm, E experts, out-proj
    NC = ((n_blocks * D + 127) // 128) * 128   # lane-dense / v6e-v7x friendly

    def reorg(aw):
        # torch adapt weight (D*D, A), flat row index o*D + i  ->  (D*A, D)
        # rows indexed i*A + a, cols o, so kron(I_D, adapt) @ R lands directly
        # in (in, out) layout -- no in-kernel reshape/transpose.
        return aw.reshape(D, D, A).transpose(1, 2, 0).reshape(D * A, D)

    def base(w, ab):
        # Base weight plus the constant adapt-bias delta, in (in, out) layout.
        return (w + ab.reshape(D, D)).T

    r_blocks = ([reorg(p['atm_w']), reorg(p['acm_w'])]
                + [reorg(p['ae_w'][e]) for e in range(E)]
                + [jnp.zeros((D * A, D), f32)])              # out-proj: no delta
    w_blocks = ([base(p['wtm'], p['atm_b']), base(p['wcm'], p['acm_b'])]
                + [base(p['we'][e], p['ae_b'][e]) for e in range(E)]
                + [p['wo'].T])
    r_all = jnp.concatenate(r_blocks, axis=1)                # (D*A, n_blocks*D)
    w_all = jnp.concatenate(w_blocks, axis=1)                # (D,   n_blocks*D)
    pad = NC - w_all.shape[1]
    if pad:
        r_all = jnp.pad(r_all, ((0, 0), (0, pad)))
        w_all = jnp.pad(w_all, ((0, 0), (0, pad)))

    b_stack = jnp.stack([p['btm'], p['bcm']]
                        + [p['be'][e] for e in range(E)])[:, None, :]  # (2+E,1,D)

    # Tiny 0/1 constant used to tile adapt along the kron columns (D*A^2 elems;
    # the big D^2*A selector mask is built in-kernel from iotas instead).
    tile = jnp.tile(jnp.eye(A, dtype=f32), (1, D))           # (A, D*A)

    return {
        'wf_t': p['wf'].T.astype(bf16), 'bf': p['bf'][None, :].astype(f32),
        'wg_t': p['wg'].T.astype(bf16), 'bg': p['bg'][None, :].astype(f32),
        'tile': tile.astype(bf16),
        'r_all': r_all.astype(bf16),                          # the big slab
        'w_all': w_all.astype(f32),                           # small, keep f32
        'b': b_stack.astype(f32), 'bo': p['bo'][None, :].astype(f32),
    }


# ----------------------------------------------------------------------------
# Forward: a single pallas_call on a (S, D) slab, embed dim on the lanes.
# TODO(synk): if B > 1 or S grows, add a "parallel" grid axis over S tiles so
# v7x's second TensorCore is used; at S=8 there is nothing to split.
# TODO(synk): for repeated per-step calls, keep the prepared weights resident
# across calls (cross-call VMEM residency) instead of re-DMA-ing ~0.3 MB.
# ----------------------------------------------------------------------------
@jax.jit
def lfm_forward(x, pp):
    B, S, D = x.shape
    assert B == 1, "original torch AdaptiveLinear .view() requires batch == 1"
    A = pp['wf_t'].shape[1]
    E = pp['wg_t'].shape[1]
    NC = pp['r_all'].shape[1]
    vmem = pl.BlockSpec(memory_space=pltpu.MemorySpace.VMEM)

    args = (x[0].astype(jnp.float32),
            pp['wf_t'], pp['bf'], pp['wg_t'], pp['bg'], pp['tile'],
            pp['r_all'], pp['w_all'], pp['b'], pp['bo'])

    flops = 2 * (D * A                       # featurizer
                 + A * E                     # gating
                 + A * D * A                 # adapt tiling
                 + D * (D * A) * NC          # fused delta matmul
                 + 4 * S * D * D)            # tm, cm, moe, out-proj
    bytes_accessed = (sum(int(np.prod(a.shape)) * a.dtype.itemsize
                          for a in args) + S * D * 4)
    cost = pl.CostEstimate(flops=flops, transcendentals=E + 1,
                           bytes_accessed=bytes_accessed)

    out2d = pl.pallas_call(
        functools.partial(_lfm_kernel, approx_recip=True),
        out_shape=jax.ShapeDtypeStruct((S, D), jnp.float32),
        in_specs=[vmem] * len(args),
        out_specs=vmem,
        cost_estimate=cost,
    )(*args)
    return out2d[None, :, :]                                 # (1, S, D)


# ----------------------------------------------------------------------------
# Pure-JAX reference (mirrors the torch forward, intended semantics).
# ----------------------------------------------------------------------------
def lfm_reference(x, p):
    B, S, D = x.shape
    E = p['wg'].shape[0]
    adapt = x.mean(axis=1) @ p['wf'].T + p['bf']             # (1, A)

    def adaptive_linear(inp, w, b, aw, ab):
        dw = (adapt @ aw.T + ab).reshape(D, D)               # (out, in); B==1
        return inp @ (w + dw).T + b

    y = x[0]
    y = adaptive_linear(y, p['wtm'], p['btm'], p['atm_w'], p['atm_b'])
    y = adaptive_linear(y, p['wcm'], p['bcm'], p['acm_w'], p['acm_b'])
    gate = jax.nn.softmax(adapt @ p['wg'].T + p['bg'], axis=-1)  # (1, E)
    moe = jnp.zeros_like(y)
    for e in range(E):
        moe = moe + gate[0, e] * adaptive_linear(
            y, p['we'][e], p['be'][e], p['ae_w'][e], p['ae_b'][e])
    out = moe @ p['wo'].T + p['bo']
    return out[None, :, :]


# ----------------------------------------------------------------------------
# Deterministic parameter init (shapes match the torch module __init__).
# ----------------------------------------------------------------------------
def init_params(key, D, A, E):
    ks = jax.random.split(key, 18)

    def nrm(k, shape, scale):
        return (scale * jax.random.normal(k, shape)).astype(jnp.float32)

    sD = 1.0 / (D ** 0.5)
    sA = 0.5 / (A ** 0.5)
    return {
        'wf': nrm(ks[0], (A, D), sD),     'bf': nrm(ks[1], (A,), 0.1),
        'wtm': nrm(ks[2], (D, D), sD),    'btm': nrm(ks[3], (D,), 0.1),
        'atm_w': nrm(ks[4], (D * D, A), sA), 'atm_b': nrm(ks[5], (D * D,), 0.1),
        'wcm': nrm(ks[6], (D, D), sD),    'bcm': nrm(ks[7], (D,), 0.1),
        'acm_w': nrm(ks[8], (D * D, A), sA), 'acm_b': nrm(ks[9], (D * D,), 0.1),
        'wg': nrm(ks[10], (E, A), 1.0 / (A ** 0.5)), 'bg': nrm(ks[11], (E,), 0.1),
        'we': nrm(ks[12], (E, D, D), sD), 'be': nrm(ks[13], (E, D), 0.1),
        'ae_w': nrm(ks[14], (E, D * D, A), sA), 'ae_b': nrm(ks[15], (E, D * D), 0.1),
        'wo': nrm(ks[16], (D, D), sD),    'bo': nrm(ks[17], (D,), 0.1),
    }


if __name__ == "__main__":
    D, A, E = 32, 16, 4          # token_dim = channel_dim = expert_dim = 32
    B, S = 1, 8                  # batch must be 1 (torch .view constraint)

    key = jax.random.PRNGKey(0)
    kx, kp = jax.random.split(key)
    x = jax.random.normal(kx, (B, S, D), dtype=jnp.float32)
    params = init_params(kp, D, A, E)

    prepped = prepare_params(params)     # one-time layout / dtype prep
    out = lfm_forward(x, prepped)
    out = jax.block_until_ready(out)

    ref = lfm_reference(x, params)
    assert out.shape == (B, S, D)
    np.testing.assert_allclose(np.asarray(out), np.asarray(ref),
                               rtol=5e-2, atol=5e-2)
    print("KERNEL_OK")
</pallas_src>

<mosaic_0001>
module attributes {stable_mosaic.version = 11 : i64} {
  func.func @_lfm_kernel(%arg0: memref<8x32xf32, #tpu.memory_space<vmem>>, %arg1: memref<32x16xbf16, #tpu.memory_space<vmem>>, %arg2: memref<1x16xf32, #tpu.memory_space<vmem>>, %arg3: memref<16x4xbf16, #tpu.memory_space<vmem>>, %arg4: memref<1x4xf32, #tpu.memory_space<vmem>>, %arg5: memref<16x512xbf16, #tpu.memory_space<vmem>>, %arg6: memref<512x256xbf16, #tpu.memory_space<vmem>>, %arg7: memref<32x256xf32, #tpu.memory_space<vmem>>, %arg8: memref<6x1x32xf32, #tpu.memory_space<vmem>>, %arg9: memref<1x32xf32, #tpu.memory_space<vmem>>, %arg10: memref<8x32xf32, #tpu.memory_space<vmem>>) attributes {dimension_semantics = [], scalar_prefetch = 0 : i64, scratch_operands = 0 : i64, tpu.core_type = #tpu.core_type<tc>} {
    %c0 = arith.constant 0 : index
    %c0_0 = arith.constant 0 : index
    %0 = vector.load %arg0[%c0, %c0_0] : memref<8x32xf32, #tpu.memory_space<vmem>>, vector<8x32xf32>
    %cst = arith.constant dense<0.000000e+00> : vector<32xf32>
    %1 = vector.multi_reduction <add>, %0, %cst [0] : vector<8x32xf32> to vector<32xf32>
    %2 = vector.shape_cast %1 : vector<32xf32> to vector<1x32xf32>
    %cst_1 = arith.constant 8.000000e+00 : f32
    %3 = vector.broadcast %cst_1 : f32 to vector<1x32xf32>
    %4 = arith.divf %2, %3 : vector<1x32xf32>
    %5 = arith.truncf %4 : vector<1x32xf32> to vector<1x32xbf16>
    %c0_2 = arith.constant 0 : index
    %c0_3 = arith.constant 0 : index
    %6 = vector.load %arg1[%c0_2, %c0_3] : memref<32x16xbf16, #tpu.memory_space<vmem>>, vector<32x16xbf16>
    %cst_4 = arith.constant dense<0.000000e+00> : vector<1x16xf32>
    %7 = tpu.matmul %5, %6, %cst_4 {dimension_numbers = #tpu.dot_dimension_numbers<[1], [0], [0], [1], [0, 0, 1, 1], [], []>} : vector<1x32xbf16>, vector<32x16xbf16>, vector<1x16xf32> -> vector<1x16xf32>
    %c0_5 = arith.constant 0 : index
    %c0_6 = arith.constant 0 : index
    %8 = vector.load %arg2[%c0_5, %c0_6] : memref<1x16xf32, #tpu.memory_space<vmem>>, vector<1x16xf32>
    %9 = arith.addf %7, %8 : vector<1x16xf32>
    %10 = arith.truncf %9 : vector<1x16xf32> to vector<1x16xbf16>
    %c0_7 = arith.constant 0 : index
    %c0_8 = arith.constant 0 : index
    %11 = vector.load %arg3[%c0_7, %c0_8] : memref<16x4xbf16, #tpu.memory_space<vmem>>, vector<16x4xbf16>
    %cst_9 = arith.constant dense<0.000000e+00> : vector<1x4xf32>
    %12 = tpu.matmul %10, %11, %cst_9 {dimension_numbers = #tpu.dot_dimension_numbers<[1], [0], [0], [1], [0, 0, 1, 1], [], []>} : vector<1x16xbf16>, vector<16x4xbf16>, vector<1x4xf32> -> vector<1x4xf32>
    %c0_10 = arith.constant 0 : index
    %c0_11 = arith.constant 0 : index
    %13 = vector.load %arg4[%c0_10, %c0_11] : memref<1x4xf32, #tpu.memory_space<vmem>>, vector<1x4xf32>
    %14 = arith.addf %12, %13 : vector<1x4xf32>
    %cst_12 = arith.constant dense<0xFF800000> : vector<1xf32>
    %15 = vector.multi_reduction <maximumf>, %14, %cst_12 [1] : vector<1x4xf32> to vector<1xf32>
    %16 = vector.shape_cast %15 : vector<1xf32> to vector<1x1xf32>
    %17 = vector.broadcast %16 : vector<1x1xf32> to vector<1x4xf32>
    %18 = arith.subf %14, %17 : vector<1x4xf32>
    %19 = math.exp %18 : vector<1x4xf32>
    %cst_13 = arith.constant dense<0.000000e+00> : vector<1xf32>
    %20 = vector.multi_reduction <add>, %19, %cst_13 [1] : vector<1x4xf32> to vector<1xf32>
    %21 = vector.shape_cast %20 : vector<1xf32> to vector<1x1xf32>
    %22 = tpu.reciprocal %21 {approx = true} : vector<1x1xf32> -> vector<1x1xf32>
    %23 = vector.broadcast %22 : vector<1x1xf32> to vector<1x4xf32>
    %24 = arith.mulf %19, %23 : vector<1x4xf32>
    %25 = arith.truncf %9 : vector<1x16xf32> to vector<1x16xbf16>
    %c0_14 = arith.constant 0 : index
    %c0_15 = arith.constant 0 : index
    %26 = vector.load %arg5[%c0_14, %c0_15] : memref<16x512xbf16, #tpu.memory_space<vmem>>, vector<16x512xbf16>
    %cst_16 = arith.constant dense<0.000000e+00> : vector<1x512xf32>
    %27 = tpu.matmul %25, %26, %cst_16 {dimension_numbers = #tpu.dot_dimension_numbers<[1], [0], [0], [1], [0, 0, 1, 1], [], []>} : vector<1x16xbf16>, vector<16x512xbf16>, vector<1x512xf32> -> vector<1x512xf32>
    %28 = tpu.iota {dimensions = array<i32: 0>} : vector<32x512xi32>
    %29 = tpu.iota {dimensions = array<i32: 1>} : vector<32x512xi32>
    %c16_i32 = arith.constant 16 : i32
    %30 = vector.broadcast %c16_i32 : i32 to vector<32x512xi32>
    %31 = arith.muli %28, %30 : vector<32x512xi32>
    %32 = arith.cmpi sge, %29, %31 : vector<32x512xi32>
    %c1_i32 = arith.constant 1 : i32
    %33 = vector.broadcast %c1_i32 : i32 to vector<32x512xi32>
    %34 = arith.addi %28, %33 : vector<32x512xi32>
    %c16_i32_17 = arith.constant 16 : i32
    %35 = vector.broadcast %c16_i32_17 : i32 to vector<32x512xi32>
    %36 = arith.muli %34, %35 : vector<32x512xi32>
    %37 = arith.cmpi slt, %29, %36 : vector<32x512xi32>
    %38 = arith.andi %32, %37 : vector<32x512xi1>
    %cst_18 = arith.constant 0.000000e+00 : f32
    %39 = vector.shape_cast %27 : vector<1x512xf32> to vector<1x512xf32>
    %40 = vector.broadcast %39 : vector<1x512xf32> to vector<32x512xf32>
    %41 = vector.broadcast %cst_18 : f32 to vector<32x512xf32>
    %42 = arith.select %38, %40, %41 : vector<32x512xi1>, vector<32x512xf32>
    %43 = arith.truncf %42 : vector<32x512xf32> to vector<32x512xbf16>
    %c0_19 = arith.constant 0 : index
    %c0_20 = arith.constant 0 : index
    %44 = vector.load %arg6[%c0_19, %c0_20] : memref<512x256xbf16, #tpu.memory_space<vmem>>, vector<512x256xbf16>
    %cst_21 = arith.constant dense<0.000000e+00> : vector<32x256xf32>
    %45 = tpu.matmul %43, %44, %cst_21 {dimension_numbers = #tpu.dot_dimension_numbers<[1], [0], [0], [1], [0, 0, 1, 1], [], []>} : vector<32x512xbf16>, vector<512x256xbf16>, vector<32x256xf32> -> vector<32x256xf32>
    %c0_22 = arith.constant 0 : index
    %c0_23 = arith.constant 0 : index
    %46 = vector.load %arg7[%c0_22, %c0_23] : memref<32x256xf32, #tpu.memory_space<vmem>>, vector<32x256xf32>
    %47 = arith.addf %46, %45 : vector<32x256xf32>
    %48 = arith.truncf %0 : vector<8x32xf32> to vector<8x32xbf16>
    %49 = vector.extract_strided_slice %47 {offsets = [0, 0], sizes = [32, 32], strides = [1, 1]} : vector<32x256xf32> to vector<32x32xf32>
    %50 = arith.truncf %49 : vector<32x32xf32> to vector<32x32xbf16>
    %cst_24 = arith.constant dense<0.000000e+00> : vector<8x32xf32>
    %51 = tpu.matmul %48, %50, %cst_24 {dimension_numbers = #tpu.dot_dimension_numbers<[1], [0], [0], [1], [0, 0, 1, 1], [], []>} : vector<8x32xbf16>, vector<32x32xbf16>, vector<8x32xf32> -> vector<8x32xf32>
    %c0_25 = arith.constant 0 : index
    %c0_26 = arith.constant 0 : index
    %c0_27 = arith.constant 0 : index
    %52 = vector.load %arg8[%c0_25, %c0_26, %c0_27] : memref<6x1x32xf32, #tpu.memory_space<vmem>>, vector<1x1x32xf32>
    %53 = vector.shape_cast %52 : vector<1x1x32xf32> to vector<1x32xf32>
    %54 = vector.broadcast %53 : vector<1x32xf32> to vector<8x32xf32>
    %55 = arith.addf %51, %54 : vector<8x32xf32>
    %56 = arith.truncf %55 : vector<8x32xf32> to vector<8x32xbf16>
    %57 = vector.extract_strided_slice %47 {offsets = [0, 32], sizes = [32, 32], strides = [1, 1]} : vector<32x256xf32> to vector<32x32xf32>
    %58 = arith.truncf %57 : vector<32x32xf32> to vector<32x32xbf16>
    %cst_28 = arith.constant dense<0.000000e+00> : vector<8x32xf32>
    %59 = tpu.matmul %56, %58, %cst_28 {dimension_numbers = #tpu.dot_dimension_numbers<[1], [0], [0], [1], [0, 0, 1, 1], [], []>} : vector<8x32xbf16>, vector<32x32xbf16>, vector<8x32xf32> -> vector<8x32xf32>
    %c1 = arith.constant 1 : index
    %c0_29 = arith.constant 0 : index
    %c0_30 = arith.constant 0 : index
    %60 = vector.load %arg8[%c1, %c0_29, %c0_30] : memref<6x1x32xf32, #tpu.memory_space<vmem>>, vector<1x1x32xf32>
    %61 = vector.shape_cast %60 : vector<1x1x32xf32> to vector<1x32xf32>
    %62 = vector.broadcast %61 : vector<1x32xf32> to vector<8x32xf32>
    %63 = arith.addf %59, %62 : vector<8x32xf32>
    %64 = vector.extract_strided_slice %24 {offsets = [0, 0], sizes = [1, 1], strides = [1, 1]} : vector<1x4xf32> to vector<1x1xf32>
    %65 = vector.extract_strided_slice %47 {offsets = [0, 64], sizes = [32, 32], strides = [1, 1]} : vector<32x256xf32> to vector<32x32xf32>
    %66 = vector.broadcast %64 : vector<1x1xf32> to vector<32x32xf32>
    %67 = arith.mulf %66, %65 : vector<32x32xf32>
    %68 = vector.extract_strided_slice %24 {offsets = [0, 0], sizes = [1, 1], strides = [1, 1]} : vector<1x4xf32> to vector<1x1xf32>
    %c2 = arith.constant 2 : index
    %c0_31 = arith.constant 0 : index
    %c0_32 = arith.constant 0 : index
    %69 = vector.load %arg8[%c2, %c0_31, %c0_32] : memref<6x1x32xf32, #tpu.memory_space<vmem>>, vector<1x1x32xf32>
    %70 = vector.shape_cast %69 : vector<1x1x32xf32> to vector<1x32xf32>
    %71 = vector.broadcast %68 : vector<1x1xf32> to vector<1x32xf32>
    %72 = arith.mulf %71, %70 : vector<1x32xf32>
    %73 = vector.extract_strided_slice %24 {offsets = [0, 1], sizes = [1, 1], strides = [1, 1]} : vector<1x4xf32> to vector<1x1xf32>
    %74 = vector.extract_strided_slice %47 {offsets = [0, 96], sizes = [32, 32], strides = [1, 1]} : vector<32x256xf32> to vector<32x32xf32>
    %75 = vector.broadcast %73 : vector<1x1xf32> to vector<32x32xf32>
    %76 = arith.mulf %75, %74 : vector<32x32xf32>
    %77 = arith.addf %67, %76 : vector<32x32xf32>
    %c3 = arith.constant 3 : index
    %c0_33 = arith.constant 0 : index
    %c0_34 = arith.constant 0 : index
    %78 = vector.load %arg8[%c3, %c0_33, %c0_34] : memref<6x1x32xf32, #tpu.memory_space<vmem>>, vector<1x1x32xf32>
    %79 = vector.shape_cast %78 : vector<1x1x32xf32> to vector<1x32xf32>
    %80 = vector.broadcast %73 : vector<1x1xf32> to vector<1x32xf32>
    %81 = arith.mulf %80, %79 : vector<1x32xf32>
    %82 = arith.addf %72, %81 : vector<1x32xf32>
    %83 = vector.extract_strided_slice %24 {offsets = [0, 2], sizes = [1, 1], strides = [1, 1]} : vector<1x4xf32> to vector<1x1xf32>
    %84 = vector.extract_strided_slice %47 {offsets = [0, 128], sizes = [32, 32], strides = [1, 1]} : vector<32x256xf32> to vector<32x32xf32>
    %85 = vector.broadcast %83 : vector<1x1xf32> to vector<32x32xf32>
    %86 = arith.mulf %85, %84 : vector<32x32xf32>
    %87 = arith.addf %77, %86 : vector<32x32xf32>
    %c4 = arith.constant 4 : index
    %c0_35 = arith.constant 0 : index
    %c0_36 = arith.constant 0 : index
    %88 = vector.load %arg8[%c4, %c0_35, %c0_36] : memref<6x1x32xf32, #tpu.memory_space<vmem>>, vector<1x1x32xf32>
    %89 = vector.shape_cast %88 : vector<1x1x32xf32> to vector<1x32xf32>
    %90 = vector.broadcast %83 : vector<1x1xf32> to vector<1x32xf32>
    %91 = arith.mulf %90, %89 : vector<1x32xf32>
    %92 = arith.addf %82, %91 : vector<1x32xf32>
    %93 = vector.extract_strided_slice %24 {offsets = [0, 3], sizes = [1, 1], strides = [1, 1]} : vector<1x4xf32> to vector<1x1xf32>
    %94 = vector.extract_strided_slice %47 {offsets = [0, 160], sizes = [32, 32], strides = [1, 1]} : vector<32x256xf32> to vector<32x32xf32>
    %95 = vector.broadcast %93 : vector<1x1xf32> to vector<32x32xf32>
    %96 = arith.mulf %95, %94 : vector<32x32xf32>
    %97 = arith.addf %87, %96 : vector<32x32xf32>
    %c5 = arith.constant 5 : index
    %c0_37 = arith.constant 0 : index
    %c0_38 = arith.constant 0 : index
    %98 = vector.load %arg8[%c5, %c0_37, %c0_38] : memref<6x1x32xf32, #tpu.memory_space<vmem>>, vector<1x1x32xf32>
    %99 = vector.shape_cast %98 : vector<1x1x32xf32> to vector<1x32xf32>
    %100 = vector.broadcast %93 : vector<1x1xf32> to vector<1x32xf32>
    %101 = arith.mulf %100, %99 : vector<1x32xf32>
    %102 = arith.addf %92, %101 : vector<1x32xf32>
    %103 = arith.truncf %63 : vector<8x32xf32> to vector<8x32xbf16>
    %104 = arith.truncf %97 : vector<32x32xf32> to vector<32x32xbf16>
    %cst_39 = arith.constant dense<0.000000e+00> : vector<8x32xf32>
    %105 = tpu.matmul %103, %104, %cst_39 {dimension_numbers = #tpu.dot_dimension_numbers<[1], [0], [0], [1], [0, 0, 1, 1], [], []>} : vector<8x32xbf16>, vector<32x32xbf16>, vector<8x32xf32> -> vector<8x32xf32>
    %106 = vector.broadcast %102 : vector<1x32xf32> to vector<8x32xf32>
    %107 = arith.addf %105, %106 : vector<8x32xf32>
    %108 = arith.truncf %107 : vector<8x32xf32> to vector<8x32xbf16>
    %109 = vector.extract_strided_slice %47 {offsets = [0, 192], sizes = [32, 32], strides = [1, 1]} : vector<32x256xf32> to vector<32x32xf32>
    %110 = arith.truncf %109 : vector<32x32xf32> to vector<32x32xbf16>
    %cst_40 = arith.constant dense<0.000000e+00> : vector<8x32xf32>
    %111 = tpu.matmul %108, %110, %cst_40 {dimension_numbers = #tpu.dot_dimension_numbers<[1], [0], [0], [1], [0, 0, 1, 1], [], []>} : vector<8x32xbf16>, vector<32x32xbf16>, vector<8x32xf32> -> vector<8x32xf32>
    %c0_41 = arith.constant 0 : index
    %c0_42 = arith.constant 0 : index
    %112 = vector.load %arg9[%c0_41, %c0_42] : memref<1x32xf32, #tpu.memory_space<vmem>>, vector<1x32xf32>
    %113 = vector.broadcast %112 : vector<1x32xf32> to vector<8x32xf32>
    %114 = arith.addf %111, %113 : vector<8x32xf32>
    %c0_43 = arith.constant 0 : index
    %c0_44 = arith.constant 0 : index
    %115 = vector.load %arg10[%c0_43, %c0_44] : memref<8x32xf32, #tpu.memory_space<vmem>>, vector<8x32xf32>
    tpu.vector_store %arg10[%c0_43, %c0_44], %114 {strides = array<i32>} : memref<8x32xf32, #tpu.memory_space<vmem>>, vector<8x32xf32>,
    return
  }
}

</mosaic_0001>

<bundles_post_ra>
// kernel: lfm_forward.1
= control target key start
LH: loop header
LB: loop body
LE: loop exit
PB: predicated region body
PF: predicated region fallthrough
CT: control target
= control target key end

     0   :  { %15 = vsyncpa [#allocation3], 0  ;;  %s2356_s0 = inlined_call_operand.vmem [shape: f32[8,32], index: 0, kind: input, shape index: {}]   ;;  %s2357_s1 = inlined_call_operand.vmem [shape: bf16[32,16], index: 1, kind: input, shape index: {}]   ;;  %s2358_s2 = inlined_call_operand.hbm [shape: f32[1,16], index: 2, kind: input, shape index: {}]   ;;  %s2359_s3 = inlined_call_operand.vmem [shape: bf16[16,4], index: 3, kind: input, shape index: {}]   ;;  %s2360_s4 = inlined_call_operand.hbm [shape: f32[1,4], index: 4, kind: input, shape index: {}]   ;;  %s2361_s5 = inlined_call_operand.vmem [shape: bf16[16,512], index: 5, kind: input, shape index: {}]   ;;  %s2362_s6 = inlined_call_operand.hbm [shape: bf16[512,256], index: 6, kind: input, shape index: {}]   ;;  %s2363_s7 = inlined_call_operand.hbm [shape: f32[32,256], index: 7, kind: input, shape index: {}]   ;;  %s2364_s8 = inlined_call_operand.hbm [shape: f32[6,1,32], index: 8, kind: input, shape index: {}]   ;;  %s2365_s9 = inlined_call_operand.hbm [shape: f32[1,32], index: 9, kind: input, shape index: {}]   ;;  %s2366_s10 = inlined_call_operand.hbm [shape: f32[8,32], index: 10, kind: output, shape index: {}]  }
   0x1   :  { %16 = vsyncpa [#allocation6], 0 }
   0x2   :  { %17 = vsyncpa [#allocation9], 0 }
   0x3   :  { %18 = vsyncpa [#allocation12], 0  ;;  %s42_s15 = sshll.u32 %s2360_s4, 4  ;;  %s43_s15 = int_to_ptr.hbm [resolvable:$true] %s42_s15 }
   0x4   :  { %19 = vsyncpa [#allocation4], 0  ;;  %s1836_s16 = smov [#allocation5]   ;;  %s67_s20 = sshll.u32 %s2363_s7, 4  ;;  %s68_s20 = int_to_ptr.hbm [resolvable:$true] %s67_s20 }
   0x5   :  { %s44_s17 = sshll.u32 %s1836_s16, 4  ;;  %s1837_s21 = smov [#allocation8]   ;;  %s45_s17 = int_to_ptr.vmem [resolvable:$true] %s44_s17 }
   0x6   :  { %47 = dma.hbm_to_vmem [thread:$0]  %s43_s15, 16, %s45_s17, [#allocation6]  }
   0x7   :  { %s69_s22 = sshll.u32 %s1837_s21, 4  ;;  %s1838_s23 = smov 256   ;;  %s70_s22 = int_to_ptr.vmem [resolvable:$true] %s69_s22 }
   0x8   :  { %s1839_s24 = smov 16   ;;  %s29_s4 = sshll.u32 %s2358_s2, 4  ;;  %s30_s4 = int_to_ptr.hbm [resolvable:$true] %s29_s4 }
   0x9   :  { %75 = dma.hbm_to_vmem [thread:$0]  %s68_s20, 1024, %s70_s22, [#allocation9], %s1838_s23, %s1838_s23, %s1839_s24  }
   0xa   :  { %s1840_s27 = smov [#allocation2]   ;;  %s54_s7 = sshll.u32 %s2362_s6, 4  ;;  %s55_s7 = int_to_ptr.hbm [resolvable:$true] %s54_s7 }
   0xb   :  { %s31_s28 = sshll.u32 %s1840_s27, 4  ;;  %s1841_s11 = smov [#allocation7]   ;;  %s32_s28 = int_to_ptr.vmem [resolvable:$true] %s31_s28 }
   0xc   :  { %34 = dma.hbm_to_vmem [thread:$0]  %s30_s4, 16, %s32_s28, [#allocation3]  }
   0xd   :  { %s56_s12 = sshll.u32 %s1841_s11, 4  ;;  %s1842_s13 = smov 128   ;;  %s57_s12 = int_to_ptr.vmem [resolvable:$true] %s56_s12 }
   0xe   :  { %s1843_s14 = smov 8   ;;  %s80_s2 = sshll.u32 %s2364_s8, 4  ;;  %s81_s2 = int_to_ptr.hbm [resolvable:$true] %s80_s2 }
   0xf   :  { %62 = dma.hbm_to_vmem [thread:$0]  %s55_s7, 8192, %s57_s12, [#allocation6], %s1842_s13, %s1842_s13, %s1843_s14  }
  0x10   :  { %s1844_s17 = smov [#allocation10]   ;;  %s1845_s19 = smov 1  }
  0x11   :  { %s82_s18 = sshll.u32 %s1844_s17, 4  ;;  %s94_s21 = sshll.u32 %s2365_s9, 4  ;;  %s83_s18 = int_to_ptr.vmem [resolvable:$true] %s82_s18  ;;  %s95_s21 = int_to_ptr.hbm [resolvable:$true] %s94_s21 }
  0x12   :  { %88 = dma.hbm_to_vmem [thread:$0]  %s81_s2, 96, %s83_s18, [#allocation9], %s1839_s24, %s1839_s24, %s1845_s19  }
  0x13   :  { %s1846_s22 = smov [#allocation11]  }
  0x14   :  { %s96_s23 = sshll.u32 %s1846_s22, 4  ;;  %s97_s23 = int_to_ptr.vmem [resolvable:$true] %s96_s23 }
  0x15   :  { %99 = dma.hbm_to_vmem [thread:$0]  %s95_s21, 16, %s97_s23, [#allocation12]  }
  0x16   :  { %1826 = dma.done.wait [#allocation3], 16  }
  0x17   :  { %1827 = vsyncadd [#allocation3], 4294967280 }
  0x18   :  { %1828 = dma.done.wait [#allocation6], 8208  }
  0x19   :  { %1829 = vsyncadd [#allocation6], 4294959088 }
  0x1a   :  { %1830 = dma.done.wait [#allocation9], 1120  }
  0x1b   :  { %1831 = vsyncadd [#allocation9], 4294966176 }
  0x1c   :  { %1832 = dma.done.wait [#allocation12], 16  }
  0x1d   :  { %1833 = vsyncadd [#allocation12], 4294967280  ;;  %v1847_v0 = vmov 8.0   ;;  %vm2367_vm0 = vcmask 261120   ;;  %v1543_v2 = vld [vmem:[%s2357_s1 + $0x8] sm:$0xff]  ;;  %v1938_v3 = vld [vmem:[%s2356_s0] sm:$0xff] }
  0x1e   :  { %1652 = vrcp.f32 %v1847_v0  ;;  %v127_v4 = vsel %vm2367_vm0, %v1938_v3, 0.0  ;;  %169 = vmatpush.bf16.msra.mxu0 %v1543_v2  ;;  %v1542_v6 = vld [vmem:[%s2357_s1] sm:$0xff]  ;;  %v1547_v20 = vld [vmem:[%s2361_s5 + $0xc] sm:$0xf0]  ;;  %v1218_v24 = vld [vmem:[%s2361_s5 + $0x10] sm:$0xf0] }
  0x1f   :  { %v128_v7 = vrot.slane %v127_v4, 4  ;;  %v1216_v19 = vld [vmem:[%s2361_s5] sm:$0xf]  ;;  %v1545_v21 = vld [vmem:[%s2361_s5 + $0x4] sm:$0xf]  ;;  %vm186_vm2 = vcmask 130048  }
  0x20   :  { %v1544_v22 = vld [vmem:[%s2359_s3] sm:$0xff]  ;;  %v1217_v23 = vor.u32 %v1547_v20, %v1216_v19  ;;  %v1221_v25 = vor.u32 %v1545_v21, %v1218_v24  ;;  %v1224_v26 = vld [vmem:[%s2361_s5 + $0x8] sm:$0xf]  ;;  %v1548_v27 = vld [vmem:[%s2361_s5 + $0x14] sm:$0xf0]  ;;  %vm2368_vm5 = vcmask 24576  }
  0x21   :  { %v129_v9 = vadd.f32 %v128_v7, %v127_v4  ;;  %197 = vmatpush.bf16.msra.mxu1 %v1544_v22  ;;  %v1546_v28 = vld [vmem:[%s2361_s5 + $0xc] sm:$0xf]  ;;  %v1225_v29 = vor.u32 %v1548_v27, %v1224_v26  ;;  %v1226_v30 = vld [vmem:[%s2361_s5 + $0x18] sm:$0xf0]  ;;  %v1292_v32 = vld [vmem:[#allocation7 + $0x70] sm:$0xf] }
  0x22   :  { %170 = vmatpush.bf16.msra.mxu0 %v1542_v6  ;;  %246 = vmatpush.bf16.msra.mxu2 %v1217_v23  ;;  %v1229_v31 = vor.u32 %v1546_v28, %v1226_v30  ;;  %v1564_v33 = vld [vmem:[#allocation7 + $0x74] sm:$0xf0]  ;;  %v1356_v34 = vld [vmem:[#allocation7 + $0xf0] sm:$0xf]  ;;  %v1284_v37 = vld [vmem:[#allocation7 + $0x60] sm:$0xf] }
  0x23   :  { %v130_v11 = vrot.slane %v129_v9, 2  ;;  %259 = vmatpush.bf16.msra.mxu3 %v1221_v25  ;;  %v1293_v35 = vor.u32 %v1564_v33, %v1292_v32  ;;  %v1580_v36 = vld [vmem:[#allocation7 + $0xf4] sm:$0xf0]  ;;  %v1562_v38 = vld [vmem:[#allocation7 + $0x64] sm:$0xf0]  ;;  %s1848_s5 = smov 96  }
  0x24   :  { %v1653_v1 = vpop.eup %1652  ;;  %v1357_v39 = vor.u32 %v1580_v36, %v1356_v34  ;;  %v1348_v40 = vld [vmem:[#allocation7 + $0xe0] sm:$0xf]  ;;  %v1578_v41 = vld [vmem:[#allocation7 + $0xe4] sm:$0xf0]  ;;  %v1285_v42 = vor.u32 %v1562_v38, %v1284_v37  ;;  %v1276_v44 = vld [vmem:[#allocation7 + $0x50] sm:$0xf] }
  0x25   :  { %v135_v5 = vmul.f32 8.0, %v1653_v1  ;;  %v131_v13 = vadd.f32 %v130_v11, %v129_v9  ;;  %vm139_vm1 = vweird.f32 %v1653_v1  ;;  %272 = vmatpush.bf16.msrb.mxu1 %v1225_v29  ;;  %v1349_v43 = vor.u32 %v1578_v41, %v1348_v40  ;;  %v1560_v45 = vld [vmem:[#allocation7 + $0x54] sm:$0xf0]  ;;  %v1340_v46 = vld [vmem:[#allocation7 + $0xd0] sm:$0xf]  ;;  %s1849_s20 = smov 125  }
  0x26   :  { %285 = vmatpush.bf16.msrb.mxu2 %v1229_v31  ;;  %792 = vmatpush.bf16.msrb.mxu0 %v1357_v39  ;;  %v1576_v47 = vld [vmem:[#allocation7 + $0xd4] sm:$0xf0]  ;;  %v1277_v48 = vor.u32 %v1560_v45, %v1276_v44  ;;  %v1268_v50 = vld [vmem:[#allocation7 + $0x40] sm:$0xf]  ;;  %v1558_v51 = vld [vmem:[#allocation7 + $0x44] sm:$0xf0] }
  0x27   :  { %v136_v8 = vsub.f32 1.0, %v135_v5  ;;  %v132_v14 = vrot.slane %v131_v13, 1  ;;  %773 = vmatpush.bf16.msrb.mxu3 %v1293_v35  ;;  %v1341_v49 = vor.u32 %v1576_v47, %v1340_v46  ;;  %v147_v52 = vld [vmem:[#allocation2] sm:$0x1]  ;;  %v1420_v53 = vld [vmem:[#allocation7 + $0x170] sm:$0xf]  ;;  %v1269_v57 = vor.u32 %v1558_v51, %v1268_v50 }
  0x28   :  { %v1596_v54 = vld [vmem:[#allocation7 + $0x174] sm:$0xf0]  ;;  %v1332_v55 = vld [vmem:[#allocation7 + $0xc0] sm:$0xf]  ;;  %v1574_v58 = vld [vmem:[#allocation7 + $0xc4] sm:$0xf0] }
  0x29   :  { %v137_v10 = vmul.f32 %v1653_v1, %v136_v8  ;;  %v133_v16 = vadd.f32 %v132_v14, %v131_v13  ;;  %v1484_v59 = vld [vmem:[#allocation7 + $0x1f0] sm:$0xf]  ;;  %v1612_v60 = vld [vmem:[#allocation7 + $0x1f4] sm:$0xf0]  ;;  %v1421_v0 = vor.u32 %v1596_v54, %v1420_v53  ;;  %v1333_v2 = vor.u32 %v1574_v58, %v1332_v55  ;;  %v1412_v4 = vld [vmem:[#allocation7 + $0x160] sm:$0xf] }
  0x2a   :  { %793 = vmatpush.bf16.msrb.mxu0 %v1349_v43  ;;  %v1260_v62 = vld [vmem:[#allocation7 + $0x30] sm:$0xf]  ;;  %v1556_v63 = vld [vmem:[#allocation7 + $0x34] sm:$0xf0]  ;;  %v1594_v5 = vld [vmem:[#allocation7 + $0x164] sm:$0xf0]  ;;  %v1485_v6 = vor.u32 %v1612_v60, %v1484_v59 }
  0x2b   :  { %v138_v12 = vadd.f32 %v1653_v1, %v137_v10  ;;  %774 = vmatpush.bf16.msrb.mxu3 %v1285_v42  ;;  %v1261_v7 = vor.u32 %v1556_v63, %v1260_v62  ;;  %v1324_v8 = vld [vmem:[#allocation7 + $0xb0] sm:$0xf]  ;;  %v1572_v9 = vld [vmem:[#allocation7 + $0xb4] sm:$0xf0]  ;;  %v1413_v10 = vor.u32 %v1594_v5, %v1412_v4  ;;  %v1570_v20 = vld [vmem:[#allocation7 + $0xa4] sm:$0xf0] }
  0x2c   :  { %v1325_v11 = vor.u32 %v1572_v9, %v1324_v8  ;;  %v1592_v13 = vld [vmem:[#allocation7 + $0x154] sm:$0xf0]  ;;  %v1476_v21 = vld [vmem:[#allocation7 + $0x1e0] sm:$0xf]  ;;  %v1610_v22 = vld [vmem:[#allocation7 + $0x1e4] sm:$0xf0] }
  0x2d   :  { %v140_v15 = vsel %vm139_vm1, %v1653_v1, %v138_v12  ;;  %v1404_v12 = vld [vmem:[#allocation7 + $0x150] sm:$0xf]  ;;  %v1477_v24 = vor.u32 %v1610_v22, %v1476_v21  ;;  %v1396_v25 = vld [vmem:[#allocation7 + $0x140] sm:$0xf]  ;;  %v1590_v26 = vld [vmem:[#allocation7 + $0x144] sm:$0xf0] }
  0x2e   :  { %v141_v17 = vmul.f32 %v140_v15, %v133_v16  ;;  %794 = vmatpush.bf16.msrb.mxu0 %v1341_v49  ;;  %v1405_v15 = vor.u32 %v1592_v13, %v1404_v12  ;;  %v1252_v16 = vld [vmem:[#allocation7 + $0x20] sm:$0xf]  ;;  %v1397_v27 = vor.u32 %v1590_v26, %v1396_v25  ;;  %v1244_v28 = vld [vmem:[#allocation7 + $0x10] sm:$0xf]  ;;  %v1552_v29 = vld [vmem:[#allocation7 + $0x14] sm:$0xf0] }
  0x2f   :  { %775 = vmatpush.bf16.msrb.mxu3 %v1277_v48  ;;  %v1308_v30 = vld [vmem:[#allocation7 + $0x90] sm:$0xf]  ;;  %v1245_v31 = vor.u32 %v1552_v29, %v1244_v28  ;;  %v1568_v32 = vld [vmem:[#allocation7 + $0x94] sm:$0xf0]  ;;  %v1236_v40 = vld [vmem:[#allocation7] sm:$0xf] }
  0x30   :  { %v142_v18 = vpack.c.bf16 %v141_v17, %v141_v17  ;;  %v1554_v17 = vld [vmem:[#allocation7 + $0x24] sm:$0xf0]  ;;  %v1468_v33 = vld [vmem:[#allocation7 + $0x1d0] sm:$0xf]  ;;  %v1608_v34 = vld [vmem:[#allocation7 + $0x1d4] sm:$0xf0]  ;;  %v1309_v35 = vor.u32 %v1568_v32, %v1308_v30 }
  0x31   :  { %v1253_v19 = vor.u32 %v1554_v17, %v1252_v16  ;;  %v1469_v36 = vor.u32 %v1608_v34, %v1468_v33  ;;  %v1388_v37 = vld [vmem:[#allocation7 + $0x130] sm:$0xf]  ;;  %v1588_v38 = vld [vmem:[#allocation7 + $0x134] sm:$0xf0]  ;;  %v1550_v41 = vld [vmem:[#allocation7 + $0x4] sm:$0xf0] }
  0x32   :  { %1208 = vmatmul.msk.bf16.vlgmr.msra.gmra.mxu0 %vm2367_vm0, %v142_v18  ;;  %v1316_v18 = vld [vmem:[#allocation7 + $0xa0] sm:$0xf]  ;;  %v1389_v39 = vor.u32 %v1588_v38, %v1388_v37  ;;  %v1237_v43 = vor.u32 %v1550_v41, %v1236_v40  ;;  %v1566_v44 = vld [vmem:[#allocation7 + $0x84] sm:$0xf0]  ;;  %v1604_v53 = vld [vmem:[#allocation7 + $0x1b4] sm:$0xf0] }
  0x33   :  { %776 = vmatpush.bf16.msrb.mxu3 %v1269_v57  ;;  %795 = vmatpush.bf16.msrb.mxu0 %v1333_v2  ;;  %v1317_v23 = vor.u32 %v1570_v20, %v1316_v18  ;;  %v1300_v42 = vld [vmem:[#allocation7 + $0x80] sm:$0xf]  ;;  %v1606_v46 = vld [vmem:[#allocation7 + $0x1c4] sm:$0xf0]  ;;  %v1563_v54 = vld [vmem:[#allocation7 + $0x74] sm:$0xf] }
  0x34   :  { %v1460_v45 = vld [vmem:[#allocation7 + $0x1c0] sm:$0xf]  ;;  %v1301_v47 = vor.u32 %v1566_v44, %v1300_v42  ;;  %v1586_v50 = vld [vmem:[#allocation7 + $0x124] sm:$0xf0]  ;;  %v1294_v55 = vld [vmem:[#allocation7 + $0x78] sm:$0xf0] }
  0x35   :  { %v1461_v48 = vor.u32 %v1606_v46, %v1460_v45  ;;  %v1380_v49 = vld [vmem:[#allocation7 + $0x120] sm:$0xf]  ;;  %v1297_v58 = vor.u32 %v1563_v54, %v1294_v55  ;;  %v1358_v59 = vld [vmem:[#allocation7 + $0xf8] sm:$0xf0]  ;;  %v1372_v60 = vld [vmem:[#allocation7 + $0x110] sm:$0xf] }
  0x36   :  { %v1381_v51 = vor.u32 %v1586_v50, %v1380_v49  ;;  %v1584_v63 = vld [vmem:[#allocation7 + $0x114] sm:$0xf0]  ;;  %v1602_v2 = vld [vmem:[#allocation7 + $0x1a4] sm:$0xf0]  ;;  %v1561_v5 = vld [vmem:[#allocation7 + $0x64] sm:$0xf] }
  0x37   :  { %777 = vmatpush.bf16.msrb.mxu3 %v1261_v7  ;;  %796 = vmatpush.bf16.msrb.mxu0 %v1325_v11  ;;  %v1577_v8 = vld [vmem:[#allocation7 + $0xe4] sm:$0xf]  ;;  %v1350_v9 = vld [vmem:[#allocation7 + $0xe8] sm:$0xf0]  ;;  %v1364_v12 = vld [vmem:[#allocation7 + $0x100] sm:$0xf] }
  0x38   :  { %v1353_v11 = vor.u32 %v1577_v8, %v1350_v9  ;;  %v1582_v13 = vld [vmem:[#allocation7 + $0x104] sm:$0xf0]  ;;  %v1600_v16 = vld [vmem:[#allocation7 + $0x194] sm:$0xf0]  ;;  %v1559_v17 = vld [vmem:[#allocation7 + $0x54] sm:$0xf] }
  0x39   :  { %v1575_v20 = vld [vmem:[#allocation7 + $0xd4] sm:$0xf]  ;;  %v1342_v21 = vld [vmem:[#allocation7 + $0xd8] sm:$0xf0]  ;;  %v1428_v30 = vld [vmem:[#allocation7 + $0x180] sm:$0xf] }
  0x3a   :  { %v1422_v25 = vld [vmem:[#allocation7 + $0x178] sm:$0xf0]  ;;  %v1557_v33 = vld [vmem:[#allocation7 + $0x44] sm:$0xf]  ;;  %v1270_v34 = vld [vmem:[#allocation7 + $0x48] sm:$0xf0] }
  0x3b   :  { %778 = vmatpush.bf16.msrb.mxu3 %v1253_v19  ;;  %797 = vmatpush.bf16.msrb.mxu0 %v1317_v23  ;;  %v1278_v19 = vld [vmem:[#allocation7 + $0x58] sm:$0xf0]  ;;  %v1345_v23 = vor.u32 %v1575_v20, %v1342_v21  ;;  %v1334_v37 = vld [vmem:[#allocation7 + $0xc8] sm:$0xf0]  ;;  %v1593_v38 = vld [vmem:[#allocation7 + $0x164] sm:$0xf] }
  0x3c   :  { %v1281_v22 = vor.u32 %v1559_v17, %v1278_v19  ;;  %v1555_v45 = vld [vmem:[#allocation7 + $0x34] sm:$0xf]  ;;  %v1262_v46 = vld [vmem:[#allocation7 + $0x38] sm:$0xf0]  ;;  %v1589_v9 = vld [vmem:[#allocation7 + $0x144] sm:$0xf] }
  0x3d   :  { %v1611_v50 = vld [vmem:[#allocation7 + $0x1f4] sm:$0xf]  ;;  %v1406_v54 = vld [vmem:[#allocation7 + $0x158] sm:$0xf0]  ;;  %v2383_v17 = vmov 0  ;;  %v2385_v21 = vmov 0 }
  0x3e   :  { %v1567_v19 = vld [vmem:[#allocation7 + $0x94] sm:$0xf]  ;;  %v1310_v20 = vld [vmem:[#allocation7 + $0x98] sm:$0xf0]  ;;  %s1850_s6 = smov 127   ;;  %s1851_s21 = smov 126  }
  0x3f   :  { %779 = vmatpush.bf16.msrb.mxu3 %v1245_v31  ;;  %798 = vmatpush.bf16.msrb.mxu0 %v1309_v35  ;;  %v1598_v31 = vld [vmem:[#allocation7 + $0x184] sm:$0xf0]  ;;  %v1573_v35 = vld [vmem:[#allocation7 + $0xc4] sm:$0xf]  ;;  %s1853_s9 = smov 64   ;;  %s1854_s25 = smov 32  }
  0x40   :  { %v1429_v32 = vor.u32 %v1598_v31, %v1428_v30  ;;  %v1337_v40 = vor.u32 %v1573_v35, %v1334_v37  ;;  %v1587_v30 = vld [vmem:[#allocation7 + $0x134] sm:$0xf]  ;;  %v1549_v35 = vld [vmem:[#allocation7 + $0x4] sm:$0xf]  ;;  %s1858_s26 = smov [#allocation13]   ;;  %s1187_s1 = sshll.u32 %s2366_s10, 4  ;;  %s1188_s1 = int_to_ptr.hbm [resolvable:$true] %s1187_s1 }
  0x41   :  { %s1185_s4 = sshll.u32 %s1858_s26, 4  ;;  %s1186_s4 = int_to_ptr.vmem [resolvable:$true] %s1185_s4 }
  0x43   :  { %780 = vmatpush.bf16.msrb.mxu3 %v1237_v43  ;;  %799 = vmatpush.bf16.msrb.mxu0 %v1301_v47  ;;  %v1571_v47 = vld [vmem:[#allocation7 + $0xb4] sm:$0xf] }
  0xaf   :  { %v172_v56 = vpop.f32.mrf.mxu0 }
  0xb0   :  { %v173_v61 = vadd.f32 %v172_v56, %v147_v52  ;;  %v1452_v52 = vld [vmem:[#allocation7 + $0x1b0] sm:$0xf]  ;;  %v1579_v56 = vld [vmem:[#allocation7 + $0xf4] sm:$0xf] }
  0xb1   :  { %v1453_v57 = vor.u32 %v1604_v53, %v1452_v52  ;;  %v1361_v62 = vor.u32 %v1579_v56, %v1358_v59  ;;  %v179_v52 = vld [vmem:[#allocation5] sm:$0x1]  ;;  %v1591_v53 = vld [vmem:[#allocation7 + $0x154] sm:$0xf]  ;;  %v1553_v59 = vld [vmem:[#allocation7 + $0x24] sm:$0xf] }
  0xb2   :  { %v176_v1 = vpack.c.bf16 %v173_v61, %v173_v61  ;;  %v291_v61 = vlaneseq }
  0xb3   :  { %868 = vmatpush.bf16.msra.mxu0 %v1361_v62  ;;  %v1409_v62 = vor.u32 %v1591_v53, %v1406_v54  ;;  %v1585_v53 = vld [vmem:[#allocation7 + $0x124] sm:$0xf]  ;;  %v1382_v54 = vld [vmem:[#allocation7 + $0x128] sm:$0xf0] }
  0xb4   :  { %1213 = vmatmul.msk.bf16.vlgmr.msra.gmra.mxu1 %vm186_vm2, %v176_v1  ;;  %1230 = vmatmul.msk.bf16.vlgmr.msra.gmra.mxu2 %vm186_vm2, %v176_v1  ;;  %v1981_v28 = vand.u32 127, %v291_v61 }
  0xb5   :  { %1231 = vmatmul.msk.bf16.vlgmr.msra.gmra.mxu3 %vm186_vm2, %v176_v1  ;;  %811 = vmatpush.bf16.msra.mxu1 %v1421_v0  ;;  %v1373_v0 = vor.u32 %v1584_v63, %v1372_v60  ;;  %v1254_v60 = vld [vmem:[#allocation7 + $0x28] sm:$0xf0]  ;;  %v1569_v63 = vld [vmem:[#allocation7 + $0xa4] sm:$0xf] }
  0xb6   :  { %830 = vmatpush.bf16.msra.mxu2 %v1485_v6  ;;  %849 = vmatpush.bf16.msra.mxu3 %v1297_v58  ;;  %v1286_v6 = vld [vmem:[#allocation7 + $0x68] sm:$0xf0]  ;;  %v1990_v49 = vadd.s32 128, %v1981_v28 }
  0xb7   :  { %v174_v14 = vpop.f32.mrf.mxu0  ;;  %v1289_v7 = vor.u32 %v1561_v5, %v1286_v6  ;;  %869 = vmatpush.bf16.msra.mxu0 %v1353_v11  ;;  %v1478_v5 = vld [vmem:[#allocation7 + $0x1e8] sm:$0xf0] }
  0xb8   :  { %v1365_v14 = vor.u32 %v1582_v13, %v1364_v12  ;;  %v1398_v11 = vld [vmem:[#allocation7 + $0x148] sm:$0xf0] }
  0xb9   :  { %812 = vmatpush.bf16.msra.mxu1 %v1413_v10  ;;  %v1978_v10 = vshrl.u32 %v291_v61, 7  ;;  %v1401_v13 = vor.u32 %v1589_v9, %v1398_v11 }
  0xba   :  { %831 = vmatpush.bf16.msra.mxu2 %v1477_v24  ;;  %850 = vmatpush.bf16.msra.mxu3 %v1289_v7  ;;  %v1595_v24 = vld [vmem:[#allocation7 + $0x174] sm:$0xf] }
  0xbb   :  { %v293_v26 = vadd.s32 8, %v1978_v10  ;;  %v321_v29 = vadd.s32 1, %v1978_v10  ;;  %870 = vmatpush.bf16.msra.mxu0 %v1345_v23  ;;  %v1985_v42 = vmul.u32 16, %v1978_v10  ;;  %v294_v12 = vadd.s32 16, %v1978_v10 }
  0xbd   :  { %813 = vmatpush.bf16.msra.mxu1 %v1405_v15  ;;  %v1436_v15 = vld [vmem:[#allocation7 + $0x190] sm:$0xf]  ;;  %v322_v43 = vadd.s32 1, %v293_v26  ;;  %v1987_v44 = vmul.u32 16, %v321_v29  ;;  %v1992_v55 = vmul.u32 16, %v293_v26  ;;  %vm305_vm3 = vcmp.ge.s32.totalorder %v1981_v28, %v1985_v42 }
  0xbe   :  { %832 = vmatpush.bf16.msra.mxu2 %v1469_v36  ;;  %v1437_v18 = vor.u32 %v1600_v16, %v1436_v15  ;;  %851 = vmatpush.bf16.msra.mxu3 %v1281_v22  ;;  %v1273_v36 = vor.u32 %v1557_v33, %v1270_v34  ;;  %vm306_vm6 = vcmp.ge.s32.totalorder %v1990_v49, %v1985_v42  ;;  %v1246_v15 = vld [vmem:[#allocation7 + $0x18] sm:$0xf0]  ;;  %v295_v22 = vadd.s32 24, %v1978_v10 }
  0xbf   :  { %871 = vmatpush.bf16.msra.mxu0 %v1337_v40  ;;  %v1994_v56 = vmul.u32 16, %v322_v43  ;;  %vm329_vm4 = vcmp.lt.s32.totalorder %v1981_v28, %v1987_v44  ;;  %vm330_vm7 = vcmp.lt.s32.totalorder %v1990_v49, %v1987_v44  ;;  %vm309_vm8 = vcmp.ge.s32.totalorder %v1981_v28, %v1992_v55  ;;  %v1390_v10 = vld [vmem:[#allocation7 + $0x138] sm:$0xf0]  ;;  %v1302_v40 = vld [vmem:[#allocation7 + $0x88] sm:$0xf0] }
  0xc0   :  { %vm2019_vm10 = vmand %vm305_vm3, %vm329_vm4  ;;  %vm310_vm11 = vcmp.ge.s32.totalorder %v1990_v49, %v1992_v55  ;;  %v323_v33 = vadd.s32 1, %v294_v12  ;;  %v1393_v34 = vor.u32 %v1587_v30, %v1390_v10  ;;  %v2408_v10 = vmov 0 }
  0xc1   :  { %814 = vmatpush.bf16.msra.mxu1 %v1397_v27  ;;  %v1425_v27 = vor.u32 %v1595_v24, %v1422_v25  ;;  %vm333_vm9 = vcmp.lt.s32.totalorder %v1981_v28, %v1994_v56  ;;  %v2384_v17 = vsel %vm2019_vm10, 4294967295, %v2383_v17  ;;  %vm334_vm12 = vcmp.lt.s32.totalorder %v1990_v49, %v1994_v56  ;;  %vm2036_vm13 = vmand %vm306_vm6, %vm330_vm7  ;;  %v1607_v24 = vld [vmem:[#allocation7 + $0x1d4] sm:$0xf]  ;;  %v1470_v25 = vld [vmem:[#allocation7 + $0x1d8] sm:$0xf0] }
  0xc2   :  { %833 = vmatpush.bf16.msra.mxu2 %v1461_v48  ;;  %852 = vmatpush.bf16.msra.mxu3 %v1273_v36  ;;  %v1326_v48 = vld [vmem:[#allocation7 + $0xb8] sm:$0xf0]  ;;  %v2386_v21 = vsel %vm2036_vm13, 4294967295, %v2385_v21  ;;  %vm2047_vm14 = vmand %vm309_vm8, %vm333_vm9  ;;  %v1473_v29 = vor.u32 %v1607_v24, %v1470_v25  ;;  %v1238_v36 = vld [vmem:[#allocation7 + $0x8] sm:$0xf0]  ;;  %v2397_v24 = vmov 0 }
  0xc3   :  { %v1329_v58 = vor.u32 %v1571_v47, %v1326_v48  ;;  %vm2057_vm15 = vmand %vm310_vm11, %vm334_vm12  ;;  %v1605_v47 = vld [vmem:[#allocation7 + $0x1c4] sm:$0xf]  ;;  %v1462_v48 = vld [vmem:[#allocation7 + $0x1c8] sm:$0xf0] }
  0xc4   :  { %1232 = vmatmul.msk.bf16.vlgmr.msrb.gmra.mxu1 %vm186_vm2, %v176_v1  ;;  %1233 = vmatmul.msk.bf16.vlgmr.msrb.gmra.mxu2 %vm186_vm2, %v176_v1  ;;  %v1444_v1 = vld [vmem:[#allocation7 + $0x1a0] sm:$0xf]  ;;  %vm2370_vm4 = vmpackc.low %vm2047_vm14, %vm2019_vm10 }
  0xc5   :  { %815 = vmatpush.bf16.msra.mxu1 %v1389_v39  ;;  %v1445_v4 = vor.u32 %v1602_v2, %v1444_v1  ;;  %v1414_v39 = vld [vmem:[#allocation7 + $0x168] sm:$0xf0]  ;;  %872 = vmatpush.bf16.msra.mxu0 %v1329_v58  ;;  %v1257_v2 = vor.u32 %v1553_v59, %v1254_v60  ;;  %vm2369_vm7 = vmpackc.low %vm2057_vm15, %vm2036_vm13  ;;  %v2081_v58 = vmul.u32 16, %v294_v12  ;;  %v2083_v59 = vmul.u32 16, %v323_v33  ;;  %v1601_v12 = vld [vmem:[#allocation7 + $0x1a4] sm:$0xf] }
  0xc6   :  { %834 = vmatpush.bf16.msra.mxu2 %v1453_v57  ;;  %v1417_v41 = vor.u32 %v1593_v38, %v1414_v39  ;;  %v1265_v57 = vor.u32 %v1555_v45, %v1262_v46  ;;  %v1565_v39 = vld [vmem:[#allocation7 + $0x84] sm:$0xf]  ;;  %v324_v45 = vadd.s32 1, %v295_v22  ;;  %v1241_v46 = vor.u32 %v1549_v35, %v1238_v36 }
  0xc7   :  { %v1385_v60 = vor.u32 %v1585_v53, %v1382_v54  ;;  %vm313_vm11 = vcmp.ge.s32.totalorder %v1981_v28, %v2081_v58  ;;  %vm337_vm12 = vcmp.lt.s32.totalorder %v1981_v28, %v2083_v59 }
  0xc8   :  { %853 = vmatpush.bf16.msra.mxu3 %v1265_v57 }
  0xc9   :  { %816 = vmatpush.bf16.msra.mxu1 %v1381_v51  ;;  %v1486_v51 = vld [vmem:[#allocation7 + $0x1f8] sm:$0xf0] }
  0xca   :  { %835 = vmatpush.bf16.msra.mxu2 %v1445_v4  ;;  %v1489_v61 = vor.u32 %v1611_v50, %v1486_v51  ;;  %v1609_v4 = vld [vmem:[#allocation7 + $0x1e4] sm:$0xf]  ;;  %v1305_v51 = vor.u32 %v1565_v39, %v1302_v40 }
  0xcb   :  { %v1481_v8 = vor.u32 %v1609_v4, %v1478_v5  ;;  %v1374_v4 = vld [vmem:[#allocation7 + $0x118] sm:$0xf0] }
  0xcc   :  { %854 = vmatpush.bf16.msra.mxu3 %v1257_v2  ;;  %v1583_v2 = vld [vmem:[#allocation7 + $0x114] sm:$0xf] }
  0xcd   :  { %817 = vmatpush.bf16.msra.mxu1 %v1373_v0  ;;  %v1318_v0 = vld [vmem:[#allocation7 + $0xa8] sm:$0xf0]  ;;  %v1377_v11 = vor.u32 %v1583_v2, %v1374_v4 }
  0xce   :  { %836 = vmatpush.bf16.msra.mxu2 %v1437_v18  ;;  %v1321_v7 = vor.u32 %v1569_v63, %v1318_v0  ;;  %v2028_v18 = vadd.s32 256, %v1981_v28  ;;  %v2107_v0 = vmul.u32 16, %v295_v22  ;;  %v2395_v22 = vmov 0 }
  0xd0   :  { %873 = vmatpush.bf16.msra.mxu0 %v1321_v7  ;;  %vm307_vm1 = vcmp.ge.s32.totalorder %v2028_v18, %v1985_v42  ;;  %vm311_vm2 = vcmp.ge.s32.totalorder %v2028_v18, %v1992_v55  ;;  %vm331_vm3 = vcmp.lt.s32.totalorder %v2028_v18, %v1987_v44  ;;  %vm335_vm6 = vcmp.lt.s32.totalorder %v2028_v18, %v1994_v56 }
  0xd1   :  { %818 = vmatpush.bf16.msra.mxu1 %v1365_v14  ;;  %v1551_v14 = vld [vmem:[#allocation7 + $0x14] sm:$0xf]  ;;  %vm2103_vm8 = vmand %vm307_vm1, %vm331_vm3  ;;  %v2122_v7 = vadd.s32 384, %v1981_v28  ;;  %vm314_vm1 = vcmp.ge.s32.totalorder %v1990_v49, %v2081_v58 }
  0xd2   :  { %837 = vmatpush.bf16.msra.mxu2 %v1429_v32  ;;  %v1249_v23 = vor.u32 %v1551_v14, %v1246_v15  ;;  %v2389_v32 = vmov 0  ;;  %vm2117_vm9 = vmand %vm311_vm2, %vm335_vm6  ;;  %vm338_vm2 = vcmp.lt.s32.totalorder %v1990_v49, %v2083_v59  ;;  %v1581_v15 = vld [vmem:[#allocation7 + $0x104] sm:$0xf] }
  0xd3   :  { %v2390_v32 = vsel %vm2057_vm15, 4294967295, %v2389_v32  ;;  %vm2154_vm3 = vmand %vm314_vm1, %vm338_vm2  ;;  %vm312_vm6 = vcmp.ge.s32.totalorder %v2122_v7, %v1992_v55  ;;  %vm318_vm2 = vcmp.ge.s32.totalorder %v1990_v49, %v2107_v0  ;;  %vm2402_vm13 = vcmp.ge.s32.totalorder %v2122_v7, %v1985_v42  ;;  %v1597_v42 = vld [vmem:[#allocation7 + $0x184] sm:$0xf] }
  0xd4   :  { %855 = vmatpush.bf16.msra.mxu3 %v1249_v23  ;;  %v2398_v24 = vsel %vm2154_vm3, 4294967295, %v2397_v24  ;;  %v2403_v55 = vmov 0 }
  0xd5   :  { %887 = vmatpush.bf16.msrb.mxu1 %v1425_v27  ;;  %v1313_v27 = vor.u32 %v1567_v19, %v1310_v20 }
  0xd6   :  { %906 = vmatpush.bf16.msrb.mxu2 %v1489_v61  ;;  %v1603_v61 = vld [vmem:[#allocation7 + $0x1b4] sm:$0xf] }
  0xd7   :  { %874 = vmatpush.bf16.msra.mxu0 %v1313_v27  ;;  %v1599_v27 = vld [vmem:[#allocation7 + $0x194] sm:$0xf] }
  0xd8   :  { %856 = vmatpush.bf16.msra.mxu3 %v1241_v46 }
  0xd9   :  { %888 = vmatpush.bf16.msrb.mxu1 %v1417_v41 }
  0xda   :  { %907 = vmatpush.bf16.msrb.mxu2 %v1481_v8 }
  0xdb   :  { %875 = vmatpush.bf16.msra.mxu0 %v1305_v51 }
  0xdd   :  { %889 = vmatpush.bf16.msrb.mxu1 %v1409_v62  ;;  %v1454_v62 = vld [vmem:[#allocation7 + $0x1b8] sm:$0xf0] }
  0xde   :  { %908 = vmatpush.bf16.msrb.mxu2 %v1473_v29  ;;  %v1457_v8 = vor.u32 %v1603_v61, %v1454_v62  ;;  %v1438_v29 = vld [vmem:[#allocation7 + $0x198] sm:$0xf0] }
  0xe1   :  { %890 = vmatpush.bf16.msrb.mxu1 %v1401_v13  ;;  %v1446_v13 = vld [vmem:[#allocation7 + $0x1a8] sm:$0xf0] }
  0xe2   :  { %v1449_v23 = vor.u32 %v1601_v12, %v1446_v13 }
  0xe5   :  { %891 = vmatpush.bf16.msrb.mxu1 %v1393_v34 }
  0xe9   :  { %892 = vmatpush.bf16.msrb.mxu1 %v1385_v60 }
  0xed   :  { %893 = vmatpush.bf16.msrb.mxu1 %v1377_v11 }
 0x131   :  { %v199_v1 = vpop.f32.mrf.mxu1 }
 0x132   :  { %v2004_v6 = vadd.f32 %v199_v1, %v179_v52  ;;  %v1465_v52 = vor.u32 %v1605_v47, %v1462_v48  ;;  %v2109_v1 = vmul.u32 16, %v324_v45 }
 0x134   :  { %v204_v16 = vsel %vm2368_vm5, %v2004_v6, -inf  ;;  %909 = vmatpush.bf16.msrb.mxu2 %v1465_v52  ;;  %vm341_vm0 = vcmp.lt.s32.totalorder %v1981_v28, %v2109_v1  ;;  %vm2146_vm5 = vmand %vm313_vm11, %vm337_vm12  ;;  %vm336_vm11 = vcmp.lt.s32.totalorder %v2122_v7, %v1994_v56  ;;  %vm2399_vm12 = vcmp.ge.s32.totalorder %v1981_v28, %v2107_v0 }
 0x135   :  { %205 = vmax.xlane.f32.xlu0 %v204_v16  ;;  %v1366_v16 = vld [vmem:[#allocation7 + $0x108] sm:$0xf0]  ;;  %v2396_v22 = vsel %vm2146_vm5, 4294967295, %v2395_v22  ;;  %vm2168_vm1 = vmand %vm2399_vm12, %vm341_vm0  ;;  %v2406_v28 = vmov 0  ;;  %v1441_v56 = vor.u32 %v1599_v27, %v1438_v29 }
 0x136   :  { %v1369_v25 = vor.u32 %v1581_v15, %v1366_v16  ;;  %vm2405_vm0 = vmpackc.low %vm2117_vm9, %vm2103_vm8  ;;  %v931_v16 = vld [vmem:[#allocation8 + $0x30] sm:$0xff] }
 0x137   :  { %v248_v31 = vpop.f32.mrf.mxu2  ;;  %vm2188_vm12 = vmand %vm312_vm6, %vm336_vm11  ;;  %vm315_vm6 = vcmp.ge.s32.totalorder %v2028_v18, %v2081_v58  ;;  %vm339_vm11 = vcmp.lt.s32.totalorder %v2028_v18, %v2083_v59 }
 0x138   :  { %v361_v37 = vperm.slane %v248_v31, 0  ;;  %v261_v38 = vpop.f32.mrf.mxu3  ;;  %910 = vmatpush.bf16.msrb.mxu2 %v1457_v8  ;;  %v2407_v28 = vsel %vm2188_vm12, 4294967295, %v2406_v28  ;;  %894 = vmatpush.bf16.msrb.mxu1 %v1369_v25  ;;  %v1430_v31 = vld [vmem:[#allocation7 + $0x188] sm:$0xf0] }
 0x139   :  { %v362_v41 = vperm.slane %v261_v38, 0  ;;  %v201_v43 = vpop.f32.mrf.mxu1  ;;  %v1433_v36 = vor.u32 %v1597_v42, %v1430_v31 }
 0x13a   :  { %v2073_v50 = vpack.c.bf16 %v361_v37, %v361_v37 }
 0x13b   :  { %v2079_v57 = vpack.c.bf16 %v362_v41, %v362_v41 }
 0x13c   :  { %1492 = vmatmul.msk.bf16.vlgmr.msrb.gmra.mxu3 %vm2370_vm4, %v2073_v50  ;;  %vm332_vm4 = vcmp.lt.s32.totalorder %v2122_v7, %v1987_v44  ;;  %v2400_v44 = vmov 0  ;;  %911 = vmatpush.bf16.msrb.mxu2 %v1449_v23 }
 0x13d   :  { %1498 = vmatmul.msk.bf16.vlgmr.msrb.gmra.mxu0 %vm2369_vm7, %v2079_v57  ;;  %v2401_v44 = vsel %vm2168_vm1, 4294967295, %v2400_v44  ;;  %vm342_vm7 = vcmp.lt.s32.totalorder %v1990_v49, %v2109_v1  ;;  %vm2179_vm15 = vmand %vm2402_vm13, %vm332_vm4 }
 0x13e   :  { %v2404_v55 = vsel %vm2179_vm15, 4294967295, %v2403_v55  ;;  %vm2192_vm10 = vmand %vm318_vm2, %vm342_vm7  ;;  %vm319_vm2 = vcmp.ge.s32.totalorder %v2028_v18, %v2107_v0 }
 0x13f   :  { %v250_v9 = vpop.f32.mrf.mxu2  ;;  %v2409_v10 = vsel %vm2192_vm10, 4294967295, %v2408_v10  ;;  %vm2375_vm13 = vmpackc.low %vm2168_vm1, %vm2146_vm5 }
 0x140   :  { %v263_v14 = vpop.f32.mrf.mxu3  ;;  %vm2374_vm4 = vmpackc.low %vm2188_vm12, %vm2179_vm15  ;;  %912 = vmatpush.bf16.msrb.mxu2 %v1441_v56  ;;  %vm2414_vm12 = vnez %v2384_v17  ;;  %v941_v56 = vpack.c.bf16 %v1938_v3, %v1938_v3 }
 0x141   :  { %v274_v19 = vpop.f32.mrf.mxu1  ;;  %vm2377_vm7 = vmpackc.low %vm2192_vm10, %vm2154_vm3  ;;  %vm316_vm3 = vcmp.ge.s32.totalorder %v2122_v7, %v2081_v58  ;;  %v929_v14 = vld [vmem:[#allocation8 + $0x20] sm:$0xff] }
 0x142   :  { %v363_v20 = vperm.slane %v274_v19, 0  ;;  %vm2415_vm5 = vmpackc.low %vm2047_vm14, %vm2414_vm12  ;;  %vm2424_vm12 = vnez %v2404_v55 }
 0x144   :  { %v1503_v30 = vpack.c.bf16 %v363_v20, %v363_v20  ;;  %913 = vmatpush.bf16.msrb.mxu2 %v1433_v36 }
 0x146   :  { %1504 = vmatmul.msk.bf16.vlgmr.msra.gmra.mxu1 %vm2405_vm0, %v1503_v30  ;;  %vm343_vm0 = vcmp.lt.s32.totalorder %v2028_v18, %v2109_v1 }
 0x147   :  { %v287_v49 = vpop.f32.mrf.mxu2 }
 0x148   :  { %v364_v33 = vperm.slane %v287_v49, 0 }
 0x149   :  { %v276_v34 = vpop.f32.mrf.mxu1 }
 0x14a   :  { %v1509_v35 = vpack.c.bf16 %v364_v33, %v364_v33 }
 0x14c   :  { %1495 = vmatmul.msk.bf16.gmra.mxu3 %vm2375_vm13, %v2073_v50  ;;  %1510 = vmatmul.msk.bf16.vlgmr.msra.gmra.mxu2 %vm2374_vm4, %v1509_v35  ;;  %vm2233_vm4 = vmand %vm315_vm6, %vm339_vm11  ;;  %vm320_vm6 = vcmp.ge.s32.totalorder %v2122_v7, %v2107_v0  ;;  %vm344_vm11 = vcmp.lt.s32.totalorder %v2122_v7, %v2109_v1 }
 0x14d   :  { %1501 = vmatmul.msk.bf16.gmra.mxu0 %vm2377_vm7, %v2079_v57  ;;  %vm2237_vm13 = vmand %vm319_vm2, %vm343_vm0  ;;  %vm340_vm7 = vcmp.lt.s32.totalorder %v2122_v7, %v2083_v59  ;;  %v927_v59 = vld [vmem:[#allocation8 + $0x10] sm:$0xff] }
 0x14e   :  { %vm1505_vm10 = vmpackc.low %vm2237_vm13, %vm2233_vm4  ;;  %vm2416_vm13 = vnez %v2390_v32  ;;  %vm2417_vm4 = vnez %v2386_v21 }
 0x14f   :  { %v289_v37 = vpop.f32.mrf.mxu2  ;;  %vm356_vm2 = vmand %vm316_vm3, %vm340_vm7  ;;  %vm2420_vm7 = vnez %v2401_v44 }
 0x150   :  { %vm360_vm0 = vmand %vm320_vm6, %vm344_vm11  ;;  %vm2421_vm6 = vnez %v2396_v22 }
 0x151   :  { %vm1511_vm15 = vmpackc.low %vm360_vm0, %vm356_vm2  ;;  %vm2427_vm2 = vnez %v2398_v24 }
 0x152   :  { %vm2418_vm1 = vmpackc.low %vm2416_vm13, %vm2417_vm4 }
 0x153   :  { %vm2419_vm3 = vmpackc.low %vm2117_vm9, %vm2103_vm8  ;;  %vm2429_vm9 = vcmask 24576  }
 0x154   :  { %vm2422_vm14 = vmpackc.low %vm2420_vm7, %vm2421_vm6 }
 0x156   :  { %1507 = vmatmul.msk.bf16.gmra.mxu1 %vm1505_vm10, %v1503_v30 }
 0x15c   :  { %1513 = vmatmul.msk.bf16.gmra.mxu2 %vm1511_vm15, %v1509_v35  ;;  %1516 = vmatmul.msk.bf16.vlgmr.msra.gmra.mxu3 %vm2415_vm5, %v2073_v50  ;;  %vm2423_vm5 = vnez %v2407_v28 }
 0x15d   :  { %1522 = vmatmul.msk.bf16.vlgmr.msra.gmra.mxu0 %vm2418_vm1, %v2079_v57  ;;  %vm2425_vm11 = vmpackc.low %vm2423_vm5, %vm2424_vm12  ;;  %vm2426_vm1 = vnez %v2409_v10 }
 0x15e   :  { %vm2428_vm8 = vmpackc.low %vm2426_vm1, %vm2427_vm2 }
 0x166   :  { %1528 = vmatmul.msk.bf16.vlgmr.msrb.gmra.mxu1 %vm2419_vm3, %v1503_v30 }
 0x16c   :  { %1519 = vmatmul.msk.bf16.gmra.mxu3 %vm2422_vm14, %v2073_v50  ;;  %1534 = vmatmul.msk.bf16.vlgmr.msrb.gmra.mxu2 %vm2425_vm11, %v1509_v35 }
 0x16d   :  { %1525 = vmatmul.msk.bf16.gmra.mxu0 %vm2428_vm8, %v2079_v57 }
 0x176   :  { %1531 = vmatmul.msk.bf16.gmra.mxu1 %vm1505_vm10, %v1503_v30  ;;  %vm2430_vm10 = vcmask 261120  }
 0x177   :  { %vm2432_vm0 = vmmov %vm2430_vm10 }
 0x178   :  { %vm2433_vm13 = vmmov %vm2432_vm0 }
 0x179   :  { %vm2434_vm4 = vmmov %vm2432_vm0 }
 0x17c   :  { %1537 = vmatmul.msk.bf16.gmra.mxu2 %vm1511_vm15, %v1509_v35  ;;  %vm2431_vm15 = vmmov %vm2430_vm10 }
 0x1a8   :  { %v206_v17 = vpop.xlane.xlu0 %205 }
 0x1a9   :  { %v207_v18 = vsub.f32 %v2004_v6, %v206_v17  ;;  %v925_v6 = vld [vmem:[#allocation8] sm:$0xff] }
 0x1ab   :  { %v208_v21 = vmul.f32 1.442695, %v207_v18 }
 0x1ad   :  { %1654 = vpow2.f32 %v208_v21 }
 0x1b3   :  { %v1655_v26 = vpop.eup %1654 }
 0x1b4   :  { %v210_v32 = vsel %vm2429_vm9, %v1655_v26, 0.0 }
 0x1b5   :  { %211 = vadd.xlane.f32.xlu0 %v210_v32 }
 0x1ba   :  { %v801_v41 = vpop.f32.mrf.mxu0 }
 0x1bf   :  { %v782_v40 = vpop.f32.mrf.mxu3 }
 0x1c0   :  { %v802_v50 = vadd.f32 %v801_v41, %v782_v40 }
 0x1c2   :  { %v803_v46 = vpop.f32.mrf.mxu0 }
 0x1c3   :  { %v820_v43 = vpop.f32.mrf.mxu1 }
 0x1c4   :  { %v821_v51 = vadd.f32 %v820_v43, %v802_v50 }
 0x1c7   :  { %v784_v45 = vpop.f32.mrf.mxu3 }
 0x1c8   :  { %v804_v52 = vadd.f32 %v803_v46, %v784_v45 }
 0x1ca   :  { %v806_v61 = vpop.f32.mrf.mxu0 }
 0x1cb   :  { %v822_v47 = vpop.f32.mrf.mxu1 }
 0x1cc   :  { %v823_v53 = vadd.f32 %v822_v47, %v804_v52  ;;  %v932_v52 = vld [vmem:[#allocation8 + $0x38] sm:$0xff] }
 0x1cf   :  { %v839_v48 = vpop.f32.mrf.mxu2  ;;  %v787_v57 = vpop.f32.mrf.mxu3 }
 0x1d0   :  { %v840_v54 = vadd.f32 %v839_v48, %v821_v51  ;;  %v807_v5 = vadd.f32 %v806_v61, %v787_v57  ;;  %v930_v51 = vld [vmem:[#allocation8 + $0x28] sm:$0xff] }
 0x1d2   :  { %v2289_v63 = vadd.f32 %v925_v6, %v840_v54  ;;  %v808_v7 = vpop.f32.mrf.mxu0 }
 0x1d3   :  { %v825_v62 = vpop.f32.mrf.mxu1 }
 0x1d4   :  { %v826_v9 = vadd.f32 %v825_v62, %v807_v5 }
 0x1d7   :  { %v841_v58 = vpop.f32.mrf.mxu2  ;;  %v789_v4 = vpop.f32.mrf.mxu3 }
 0x1d8   :  { %v842_v60 = vadd.f32 %v841_v58, %v823_v53  ;;  %v809_v11 = vadd.f32 %v808_v7, %v789_v4  ;;  %v1852_v53 = vmov 0   ;;  %v928_v4 = vld [vmem:[#allocation8 + $0x18] sm:$0xff] }
 0x1d9   :  { %1644 = vset.pattern.permute.xlu2 %v1852_v53 }
 0x1da   :  { %v2291_v0 = vadd.f32 %v927_v59, %v842_v60  ;;  %v877_v10 = vpop.f32.mrf.mxu0 }
 0x1db   :  { %v827_v8 = vpop.f32.mrf.mxu1 }
 0x1dc   :  { %v942_v1 = vpack.c.bf16 %v2291_v0, %v2289_v63  ;;  %v828_v12 = vadd.f32 %v827_v8, %v809_v11 }
 0x1de   :  { %972 = vrot.lane.b32.xlu0 %v942_v1, %s1848_s5 }
 0x1df   :  { %v844_v2 = vpop.f32.mrf.mxu2  ;;  %v858_v49 = vpop.f32.mrf.mxu3 }
 0x1e0   :  { %v845_v13 = vadd.f32 %v844_v2, %v826_v9  ;;  %v878_v5 = vadd.f32 %v877_v10, %v858_v49 }
 0x1e2   :  { %v2296_v20 = vadd.f32 %v929_v14, %v845_v13  ;;  %v879_v34 = vpop.f32.mrf.mxu0  ;;  %v926_v14 = vld [vmem:[#allocation8 + $0x8] sm:$0xff] }
 0x1e3   :  { %v896_v42 = vpop.f32.mrf.mxu1 }
 0x1e4   :  { %v897_v8 = vadd.f32 %v896_v42, %v878_v5 }
 0x1e7   :  { %v846_v15 = vpop.f32.mrf.mxu2  ;;  %v860_v33 = vpop.f32.mrf.mxu3 }
 0x1e8   :  { %v847_v19 = vadd.f32 %v846_v15, %v828_v12  ;;  %v880_v6 = vadd.f32 %v879_v34, %v860_v33  ;;  %v1857_v33 = vmov 2  }
 0x1e9   :  { %1646 = vset.pattern.permute.xlu1 %v1857_v33 }
 0x1ea   :  { %v2298_v22 = vadd.f32 %v931_v16, %v847_v19  ;;  %v882_v38 = vpop.f32.mrf.mxu0 }
 0x1eb   :  { %v898_v35 = vpop.f32.mrf.mxu1 }
 0x1ec   :  { %v943_v23 = vpack.c.bf16 %v2298_v22, %v2296_v20  ;;  %v899_v62 = vadd.f32 %v898_v35, %v880_v6 }
 0x1ee   :  { %957 = vmatpush.bf16.msrb.mxu3 %v943_v23 }
 0x1ef   :  { %v915_v31 = vpop.f32.mrf.mxu2  ;;  %v863_v37 = vpop.f32.mrf.mxu3 }
 0x1f0   :  { %v883_v3 = vadd.f32 %v882_v38, %v863_v37  ;;  %v916_v13 = vadd.f32 %v915_v31, %v897_v8  ;;  %v1856_v31 = vmov 1  }
 0x1f1   :  { %1645 = vset.pattern.permute.xlu0 %v1856_v31 }
 0x1f2   :  { %958 = vmatpush.bf16.msrb.mxu3 %v942_v1  ;;  %v884_v21 = vpop.f32.mrf.mxu0  ;;  %v934_v15 = vadd.f32 %v926_v14, %v916_v13 }
 0x1f3   :  { %v901_v39 = vpop.f32.mrf.mxu1 }
 0x1f4   :  { %v902_v43 = vadd.f32 %v901_v39, %v883_v3 }
 0x1f5   :  { %1538 = vmatmul.msk.bf16.vlgmr.msrb.gmra.mxu3 %vm2430_vm10, %v941_v56 }
 0x1f7   :  { %v917_v36 = vpop.f32.mrf.mxu2  ;;  %v865_v18 = vpop.f32.mrf.mxu3 }
 0x1f8   :  { %v885_v32 = vadd.f32 %v884_v21, %v865_v18  ;;  %v918_v2 = vadd.f32 %v917_v36, %v899_v62  ;;  %v1650_v62 = vld [vmem:[#allocation10 + $0x1] ss:$0 sm:$0xff] }
 0x1fa   :  { %v936_v7 = vadd.f32 %v928_v4, %v918_v2 }
 0x1ff   :  { %v920_v17 = vpop.f32.mrf.mxu2 }
 0x200   :  { %v921_v48 = vadd.f32 %v920_v17, %v902_v43 }
 0x202   :  { %v2318_v54 = vadd.f32 %v930_v51, %v921_v48 }
 0x207   :  { %v922_v40 = vpop.f32.mrf.mxu2 }
 0x228   :  { %v212_v24 = vpop.xlane.xlu0 %211 }
 0x229   :  { %1656 = vrcp.f32 %v212_v24 }
 0x22f   :  { %v1657_v25 = vpop.eup %1656 }
 0x230   :  { %v2302_v27 = vmul.f32 %v1657_v25, %v1655_v26  ;;  %v903_v26 = vpop.f32.mrf.mxu1  ;;  %v1855_v25 = vmov 3  }
 0x231   :  { %v904_v45 = vadd.f32 %v903_v26, %v885_v32 }
 0x232   :  { %1083 = vrot.lane.b32.xlu2 %v2302_v27, %s1849_s20  ;;  %1009 = vrot.lane.b32.xlu1 %v2302_v27, %s1850_s6  ;;  %1613 = vpush %v2302_v27 }
 0x233   :  { %v923_v50 = vadd.f32 %v922_v40, %v904_v45 }
 0x235   :  { %v2320_v57 = vadd.f32 %v932_v52, %v923_v50 }
 0x23a   :  { %974 = vrot.lane.b32.xlu2 %v943_v23, %s1848_s5  ;;  %1046 = vrot.lane.b32.xlu1 %v2302_v27, %s1851_s21 }
 0x250   :  { %v973_v44 = vpop.permute.xlu0 %972 }
 0x263   :  { %s2312_s22 = spop %1613 }
 0x264   :  { %v996_v36 = vstv %s2312_s22 }
 0x265   :  { %v1000_v39 = vmul.f32 %v996_v36, %v2296_v20  ;;  %v1001_v17 = vmul.f32 %v996_v36, %v2298_v22  ;;  %v998_v45 = vmul.f32 %v996_v36, %v2289_v63 }
 0x28c   :  { %v1084_v29 = vpop.permute.xlu2 %1083 }
 0x294   :  { %v975_v30 = vpop.permute.xlu2 %974 }
 0x295   :  { %987 = vmatpush.bf16.msrb.mxu0 %v975_v30  ;;  %v1649_v30 = vld [vmem:[#allocation10] ss:$0 sm:$0xff] }
 0x299   :  { %988 = vmatpush.bf16.msrb.mxu0 %v973_v44  ;;  %v960_v44 = vpop.f32.mrf.mxu3 }
 0x2a1   :  { %v962_v56 = vpop.f32.mrf.mxu3 }
 0x2a2   :  { %v1651_v56 = vld [vmem:[#allocation11] ss:$0 sm:$0xff] }
 0x2a4   :  { %v1010_v55 = vpop.permute.xlu1 %1009 }
 0x2a5   :  { %1615 = vpush %v1010_v55  ;;  %v961_v55 = vadd.f32 %v1649_v30, %v960_v44 }
 0x2ac   :  { %v1047_v28 = vpop.permute.xlu1 %1046 }
 0x2ad   :  { %1617 = vpush %v1047_v28  ;;  %v964_v28 = vpack.c.bf16 %v961_v55, %v961_v55 }
 0x2ae   :  { %1619 = vpush %v1084_v29  ;;  %v1149_v29 = vpack.c.bf16 %v936_v7, %v934_v15 }
 0x2af   :  { %1539 = vmatmul.msk.bf16.vlgmr.msrb.gmra.mxu0 %vm2431_vm15, %v964_v28 }
 0x2d6   :  { %s1616_s23 = spop %1615 }
 0x2d7   :  { %v1012_v41 = vstv %s1616_s23 }
 0x2d8   :  { %v1017_v46 = vmul.f32 %v1012_v41, %v2298_v22  ;;  %v1016_v47 = vmul.f32 %v1012_v41, %v2296_v20  ;;  %v1015_v9 = vmul.f32 %v1012_v41, %v2291_v0  ;;  %v1014_v11 = vmul.f32 %v1012_v41, %v2289_v63 }
 0x2d9   :  { %v999_v41 = vmul.f32 %v996_v36, %v2291_v0  ;;  %v1150_v63 = vpack.c.bf16 %v2320_v57, %v2318_v54 }
 0x2da   :  { %1028 = vrot.lane.b32.xlu2 %v1017_v46, %s1848_s5  ;;  %1026 = vrot.lane.b32.xlu1 %v1016_v47, %s1848_s5 }
 0x2de   :  { %s1618_s8 = spop %1617 }
 0x2df   :  { %v1049_v58 = vstv %s1618_s8  ;;  %s1620_s24 = spop %1619 }
 0x2e0   :  { %v1086_v59 = vstv %s1620_s24  ;;  %v1054_v60 = vmul.f32 %v1049_v58, %v2320_v57  ;;  %v1053_v61 = vmul.f32 %v1049_v58, %v2318_v54  ;;  %v1052_v12 = vmul.f32 %v1049_v58, %v936_v7 }
 0x2e1   :  { %v1090_v1 = vmul.f32 %v1086_v59, %v2318_v54  ;;  %v1091_v16 = vmul.f32 %v1086_v59, %v2320_v57  ;;  %v1051_v19 = vmul.f32 %v1049_v58, %v934_v15  ;;  %v1088_v23 = vmul.f32 %v1086_v59, %v934_v15  ;;  %v1113_v57 = vld [vmem:[#allocation10 + $0x5] sm:$0x1] }
 0x2e2   :  { %1065 = vrot.lane.b32.xlu2 %v1054_v60, %s1853_s9  ;;  %1063 = vrot.lane.b32.xlu1 %v1053_v61, %s1853_s9  ;;  %v1089_v24 = vmul.f32 %v1086_v59, %v936_v7  ;;  %v1039_v7 = vld [vmem:[#allocation10 + $0x3] sm:$0x1] }
 0x2e3   :  { %1100 = vrot.lane.b32.xlu0 %v1090_v1, %s1854_s25 }
 0x2ea   :  { %1024 = vrot.lane.b32.xlu2 %v1015_v9, %s1848_s5  ;;  %1022 = vrot.lane.b32.xlu1 %v1014_v11, %s1848_s5  ;;  %v1003_v9 = vld [vmem:[#allocation10 + $0x2] sm:$0x1]  ;;  %v1076_v11 = vld [vmem:[#allocation10 + $0x4] sm:$0x1] }
 0x2eb   :  { %1061 = vrot.lane.b32.xlu0 %v1052_v12, %s1853_s9 }
 0x2f2   :  { %1059 = vrot.lane.b32.xlu2 %v1051_v19, %s1853_s9  ;;  %1102 = vrot.lane.b32.xlu1 %v1091_v16, %s1854_s25 }
 0x2fa   :  { %1098 = vrot.lane.b32.xlu2 %v1089_v24, %s1854_s25  ;;  %1096 = vrot.lane.b32.xlu1 %v1088_v23, %s1854_s25 }
 0x302   :  { %1005 = vperm.xlu2 %1644, %v2302_v27  }
 0x30a   :  { %1647 = vset.pattern.permute.xlu2 %v1855_v25 }
 0x30b   :  { %1115 = vperm.xlu2 %1647, %v2302_v27  }
 0x313   :  { %1157 = vrot.lane.b32.xlu2 %v1149_v29, %s1853_s9 }
 0x32c   :  { %v990_v0 = vpop.f32.mrf.mxu0 }
 0x32d   :  { %v991_v1 = vadd.f32 %v1650_v62, %v990_v0 }
 0x32f   :  { %v1120_v4 = vpack.c.bf16 %v991_v1, %v991_v1 }
 0x334   :  { %v1029_v49 = vpop.permute.xlu2 %1028  ;;  %v992_v60 = vpop.f32.mrf.mxu0 }
 0x335   :  { %v1037_v21 = vadd.f32 %v1029_v49, %v1001_v17 }
 0x33c   :  { %v1066_v42 = vpop.permute.xlu2 %1065 }
 0x33d   :  { %v1074_v32 = vadd.f32 %v1066_v42, %v1037_v21 }
 0x344   :  { %v1025_v35 = vpop.permute.xlu2 %1024 }
 0x345   :  { %v1035_v48 = vadd.f32 %v1025_v35, %v999_v41 }
 0x34c   :  { %v1027_v10 = vpop.permute.xlu1 %1026  ;;  %v1060_v3 = vpop.permute.xlu2 %1059 }
 0x34d   :  { %v1036_v18 = vadd.f32 %v1027_v10, %v1000_v39 }
 0x354   :  { %v1064_v34 = vpop.permute.xlu1 %1063  ;;  %v1099_v22 = vpop.permute.xlu2 %1098 }
 0x355   :  { %v1101_v37 = vpop.permute.xlu0 %1100  ;;  %v1073_v26 = vadd.f32 %v1064_v34, %v1036_v18 }
 0x357   :  { %v1110_v43 = vadd.f32 %v1101_v37, %v1073_v26 }
 0x35c   :  { %v1023_v38 = vpop.permute.xlu1 %1022  ;;  %v1006_v2 = vpop.permute.xlu2 %1005 }
 0x35d   :  { %v1062_v47 = vpop.permute.xlu0 %1061  ;;  %v1034_v50 = vadd.f32 %v1023_v38, %v998_v45  ;;  %v1008_v54 = vmul.f32 %v1006_v2, %v1003_v9 }
 0x35e   :  { %v1072_v52 = vadd.f32 %v1062_v47, %v1035_v48 }
 0x35f   :  { %v1071_v20 = vadd.f32 %v1060_v3, %v1034_v50 }
 0x360   :  { %v1109_v6 = vadd.f32 %v1099_v22, %v1072_v52 }
 0x364   :  { %v1103_v40 = vpop.permute.xlu1 %1102 }
 0x365   :  { %v1111_v46 = vadd.f32 %v1103_v40, %v1074_v32  ;;  %v1116_v12 = vpop.permute.xlu2 %1115 }
 0x366   :  { %v1118_v16 = vmul.f32 %v1116_v12, %v1113_v57 }
 0x367   :  { %v1122_v51 = vpack.c.bf16 %v1111_v46, %v1110_v43 }
 0x369   :  { %1128 = vrot.lane.b32.xlu0 %v1122_v51, %s1853_s9 }
 0x36c   :  { %v1097_v53 = vpop.permute.xlu1 %1096 }
 0x36d   :  { %v1108_v58 = vadd.f32 %v1097_v53, %v1071_v20 }
 0x36f   :  { %v1121_v59 = vpack.c.bf16 %v1109_v6, %v1108_v58 }
 0x371   :  { %1041 = vperm.xlu0 %1645, %v2302_v27   ;;  %1126 = vrot.lane.b32.xlu1 %v1121_v59, %s1853_s9 }
 0x379   :  { %1078 = vperm.xlu1 %1646, %v2302_v27   ;;  %1648 = vset.pattern.permute.xlu0 %v1855_v25  ;;  %v1158_v25 = vpop.permute.xlu2 %1157 }
 0x381   :  { %1159 = vrot.lane.b32.xlu1 %v1150_v63, %s1853_s9 }
 0x3db   :  { %v1129_v61 = vpop.permute.xlu0 %1128 }
 0x3dc   :  { %1141 = vmatpush.bf16.msra.mxu1 %v1129_v61 }
 0x3e3   :  { %v1127_v5 = vpop.permute.xlu1 %1126  ;;  %v1042_v8 = vpop.permute.xlu0 %1041 }
 0x3e4   :  { %1142 = vmatpush.bf16.msra.mxu1 %v1127_v5  ;;  %v1044_v27 = vmul.f32 %v1042_v8, %v1039_v7 }
 0x3e6   :  { %v1045_v14 = vadd.f32 %v1044_v27, %v1008_v54 }
 0x3e7   :  { %1540 = vmatmul.msk.bf16.vlgmr.msra.gmra.mxu1 %vm2432_vm0, %v1120_v4 }
 0x3eb   :  { %v1079_v13 = vpop.permute.xlu1 %1078 }
 0x3ec   :  { %v1081_v15 = vmul.f32 %v1079_v13, %v1076_v11 }
 0x3ee   :  { %v1082_v19 = vadd.f32 %v1081_v15, %v1045_v14 }
 0x3f0   :  { %v1119_v23 = vadd.f32 %v1118_v16, %v1082_v19 }
 0x3f2   :  { %v1123_v29 = vperm.slane %v1119_v23, 0 }
 0x3f3   :  { %v1160_v24 = vpop.permute.xlu1 %1159 }
 0x3f4   :  { %1172 = vmatpush.bf16.msra.mxu2 %v1160_v24 }
 0x3f8   :  { %1173 = vmatpush.bf16.msra.mxu2 %v1158_v25 }
 0x464   :  { %v1144_v30 = vpop.f32.mrf.mxu1 }
 0x465   :  { %v1145_v44 = vadd.f32 %v1144_v30, %v1123_v29 }
 0x467   :  { %v1148_v55 = vpack.c.bf16 %v1145_v44, %v1145_v44 }
 0x469   :  { %1541 = vmatmul.msk.bf16.vlgmr.msra.gmra.mxu2 %vm2433_vm13, %v1148_v55 }
 0x46c   :  { %v1146_v28 = vpop.f32.mrf.mxu1 }
 0x4ec   :  { %v1175_v49 = vpop.f32.mrf.mxu2 }
 0x4ed   :  { %v1176_v10 = vadd.f32 %v1651_v56, %v1175_v49 }
 0x4ef   :  { %1179 = vst.msk [vmem:[#allocation13] sm:$0xff] %vm2434_vm4, %v1176_v10 }
 0x4f0   :  { %1190 = dma.vmem_to_hbm [thread:$0]  %s1186_s4, 128, %s1188_s1, [#allocation4]  }
 0x4f4   :  { %v1177_v42 = vpop.f32.mrf.mxu2 }
 0x4f5   :  { %1834 = dma.done.wait [#allocation4], 128  }
 0x4f6   :  { %1835 = vsyncadd [#allocation4], 4294967168 }
 0x4f7   :  { %1195 = vsyncpa [#allocation3], 1 }
 0x4f8   :  { %1196 = vsyncpa [#allocation6], 1 }
 0x4f9   :  { %1197 = vsyncpa [#allocation9], 1 }
 0x4fa   :  { %1198 = vsyncpa [#allocation12], 1 }
 0x4fb   :  { %1199 = vsyncpa [#allocation4], 1 }

</bundles_post_ra>
